<compile_context>
chip_gen: v7x
topology: tpu7x:2x2x1
jax: 0.10.0
libtpu: 0.0.40
codegen_flags: <defaults>
</compile_context>

<pallas_src>
import functools
import math

import jax
import jax.numpy as jnp
from jax.experimental import pallas as pl
from jax.experimental.pallas import tpu as pltpu


def mha_wrapper_kernel(x_ref, w_ref, o_ref, *, num_heads, d_out, batch_block):
    """One grid step = `batch_block` batch rows, all heads fused."""
    H = num_heads
    T = x_ref.shape[1]
    scale = jnp.float32(1.0 / math.sqrt(d_out))

    # Causal additive mask, built once per grid step, shared by all
    # (batch row, head) pairs.  Finite large-negative instead of -inf.
    row = jax.lax.broadcasted_iota(jnp.int32, (T, T), 0)
    col = jax.lax.broadcasted_iota(jnp.int32, (T, T), 1)
    neg_mask = jnp.where(col > row, jnp.float32(-1e30), jnp.float32(0.0))

    for b in range(batch_block):            # static, unrolled (LLO-visible)
        x = x_ref[b].astype(jnp.bfloat16)   # (T, d_in) bf16 MXU operand
        for h in range(H):                  # static, unrolled
            # Per-head projections: bf16 operands, f32 accumulation.
            # Head / Q-K-V selection is leading-axis indexing (no lane slicing).
            q = jnp.dot(x, w_ref[0, h], preferred_element_type=jnp.float32)
            k = jnp.dot(x, w_ref[1, h], preferred_element_type=jnp.float32)
            v = jnp.dot(x, w_ref[2, h], preferred_element_type=jnp.float32)
            q = q * scale                   # fold 1/sqrt(d_k) into Q

            # Q @ K^T without materializing a transposed K (contract last dims).
            scores = jax.lax.dot_general(
                q.astype(jnp.bfloat16), k.astype(jnp.bfloat16),
                dimension_numbers=(((1,), (1,)), ((), ())),
                preferred_element_type=jnp.float32)             # (T, T) f32
            scores = scores + neg_mask

            # Numerically stable softmax in f32; exact divide ((T,1) column).
            m = jnp.max(scores, axis=-1, keepdims=True)
            e = jnp.exp(scores - m)
            p = e / jnp.sum(e, axis=-1, keepdims=True)

            out_h = jnp.dot(p.astype(jnp.bfloat16), v.astype(jnp.bfloat16),
                            preferred_element_type=jnp.float32)  # (T, d_out)

            # Per-head write into the output block: bounds live range to one
            # head; the HBM writeback of the whole block stays lane-dense.
            o_ref[b, :, h * d_out:(h + 1) * d_out] = out_h.astype(o_ref.dtype)


def multi_head_attention(x, wq, wk, wv, *, batch_block=None):
    """x: (B, T, d_in); wq/wk/wv: (H, d_in, d_out).  Returns (B, T, H*d_out)."""
    B, T, d_in = x.shape
    H, _, d_out = wq.shape

    if batch_block is None:
        batch_block = B                     # toy shapes: whole batch in one step
    assert B % batch_block == 0
    num_steps = B // batch_block

    # Head-major stacked weights, cast once to bf16 (MXU-native dtype, half the
    # VMEM/DMA of f32).  Layout (3, H, d_in, d_out) = [Q, K, V] x heads.
    w_qkv = jnp.stack([wq, wk, wv], axis=0).astype(jnp.bfloat16)

    kernel = functools.partial(mha_wrapper_kernel, num_heads=H, d_out=d_out,
                               batch_block=batch_block)

    return pl.pallas_call(
        kernel,
        out_shape=jax.ShapeDtypeStruct((B, T, H * d_out), x.dtype),
        grid_spec=pltpu.PrefetchScalarGridSpec(
            num_scalar_prefetch=0,
            grid=(num_steps,),
            in_specs=[
                pl.BlockSpec((batch_block, T, d_in), lambda b: (b, 0, 0)),
                # Constant index_map: same weight block every step (tiny here).
                pl.BlockSpec((3, H, d_in, d_out), lambda b: (0, 0, 0, 0)),
            ],
            out_specs=pl.BlockSpec((batch_block, T, H * d_out),
                                   lambda b: (b, 0, 0)),
        ),
        compiler_params=pltpu.CompilerParams(
            dimension_semantics=("parallel",)),
        # vmem_limit_bytes left at the default: toy blocks are KB-scale.
    )(x, w_qkv)


def reference(x, wq, wk, wv):
    """Pure-JAX f32 reference mirroring the PyTorch forward."""
    B, T, d_in = x.shape
    H, _, d_out = wq.shape
    outs = []
    for h in range(H):
        q = x @ wq[h]
        k = x @ wk[h]
        v = x @ wv[h]
        scores = jnp.einsum("btd,bsd->bts", q, k)
        mask = jnp.triu(jnp.ones((T, T), dtype=bool), k=1)
        scores = jnp.where(mask[None], -jnp.inf, scores)
        w = jax.nn.softmax(scores / math.sqrt(d_out), axis=-1)
        outs.append(jnp.einsum("bts,bsd->btd", w, v))
    return jnp.concatenate(outs, axis=-1)


if __name__ == "__main__":
    # Small shapes consistent with the module's forward: (batch, num_tokens, d_in)
    B, T = 2, 8
    d_in, d_out, num_heads = 32, 16, 4
    # dropout = 0.0, qkv_bias = False

    key = jax.random.PRNGKey(0)
    kx, kq, kk, kv = jax.random.split(key, 4)
    x = jax.random.normal(kx, (B, T, d_in), dtype=jnp.float32)
    # Deterministic per-head Linear weights (no bias), stored as (H, d_in, d_out),
    # i.e. y = x @ W  (equivalent to nn.Linear(d_in, d_out, bias=False) with weight.T).
    wq = jax.random.normal(kq, (num_heads, d_in, d_out), dtype=jnp.float32) * 0.1
    wk = jax.random.normal(kk, (num_heads, d_in, d_out), dtype=jnp.float32) * 0.1
    wv = jax.random.normal(kv, (num_heads, d_in, d_out), dtype=jnp.float32) * 0.1

    out = multi_head_attention(x, wq, wk, wv)
    out = jax.block_until_ready(out)

    ref = reference(x, wq, wk, wv)
    assert out.shape == (B, T, num_heads * d_out), out.shape
    # Tolerance reflects bf16 MXU operands (f32 accumulation) vs. the f32 reference.
    assert jnp.allclose(out, ref, atol=2e-2, rtol=2e-2), "mismatch vs reference"

    print("KERNEL_OK")
</pallas_src>

<mosaic_0001>
module attributes {stable_mosaic.version = 11 : i64} {
  func.func @mha_wrapper_kernel(%arg0: i32, %arg1: memref<2x8x32xf32, #tpu.memory_space<vmem>>, %arg2: memref<3x4x32x16xbf16, #tpu.memory_space<vmem>>, %arg3: memref<2x8x64xf32, #tpu.memory_space<vmem>>) attributes {dimension_semantics = [#tpu.dimension_semantics<parallel>], iteration_bounds = array<i64: 1>, scalar_prefetch = 0 : i64, scratch_operands = 0 : i64, tpu.core_type = #tpu.core_type<tc>, window_params = [{transform_indices = @transform_0, window_bounds = array<i64: 2, 8, 32>}, {pipeline_mode = #tpu.pipeline_mode<synchronous>, transform_indices = @transform_1, window_bounds = array<i64: 3, 4, 32, 16>}, {transform_indices = @transform_2, window_bounds = array<i64: 2, 8, 64>}]} {
    %0 = tpu.iota {dimensions = array<i32: 0>} : vector<8x8xi32>
    %1 = tpu.iota {dimensions = array<i32: 1>} : vector<8x8xi32>
    %2 = arith.cmpi sgt, %1, %0 : vector<8x8xi32>
    %cst = arith.constant -1.000000e+30 : f32
    %cst_0 = arith.constant 0.000000e+00 : f32
    %3 = vector.broadcast %cst : f32 to vector<8x8xf32>
    %4 = vector.broadcast %cst_0 : f32 to vector<8x8xf32>
    %5 = arith.select %2, %3, %4 : vector<8x8xi1>, vector<8x8xf32>
    %c0 = arith.constant 0 : index
    %c0_1 = arith.constant 0 : index
    %c0_2 = arith.constant 0 : index
    %6 = vector.load %arg1[%c0, %c0_1, %c0_2] : memref<2x8x32xf32, #tpu.memory_space<vmem>>, vector<1x8x32xf32>
    %7 = vector.shape_cast %6 : vector<1x8x32xf32> to vector<8x32xf32>
    %8 = arith.truncf %7 : vector<8x32xf32> to vector<8x32xbf16>
    %c0_3 = arith.constant 0 : index
    %c0_4 = arith.constant 0 : index
    %c0_5 = arith.constant 0 : index
    %c0_6 = arith.constant 0 : index
    %9 = vector.load %arg2[%c0_3, %c0_4, %c0_5, %c0_6] : memref<3x4x32x16xbf16, #tpu.memory_space<vmem>>, vector<1x1x32x16xbf16>
    %10 = vector.shape_cast %9 : vector<1x1x32x16xbf16> to vector<32x16xbf16>
    %cst_7 = arith.constant dense<0.000000e+00> : vector<8x16xf32>
    %11 = tpu.matmul %8, %10, %cst_7 {dimension_numbers = #tpu.dot_dimension_numbers<[1], [0], [0], [1], [0, 0, 1, 1], [], []>} : vector<8x32xbf16>, vector<32x16xbf16>, vector<8x16xf32> -> vector<8x16xf32>
    %c1 = arith.constant 1 : index
    %c0_8 = arith.constant 0 : index
    %c0_9 = arith.constant 0 : index
    %c0_10 = arith.constant 0 : index
    %12 = vector.load %arg2[%c1, %c0_8, %c0_9, %c0_10] : memref<3x4x32x16xbf16, #tpu.memory_space<vmem>>, vector<1x1x32x16xbf16>
    %13 = vector.shape_cast %12 : vector<1x1x32x16xbf16> to vector<32x16xbf16>
    %cst_11 = arith.constant dense<0.000000e+00> : vector<8x16xf32>
    %14 = tpu.matmul %8, %13, %cst_11 {dimension_numbers = #tpu.dot_dimension_numbers<[1], [0], [0], [1], [0, 0, 1, 1], [], []>} : vector<8x32xbf16>, vector<32x16xbf16>, vector<8x16xf32> -> vector<8x16xf32>
    %c2 = arith.constant 2 : index
    %c0_12 = arith.constant 0 : index
    %c0_13 = arith.constant 0 : index
    %c0_14 = arith.constant 0 : index
    %15 = vector.load %arg2[%c2, %c0_12, %c0_13, %c0_14] : memref<3x4x32x16xbf16, #tpu.memory_space<vmem>>, vector<1x1x32x16xbf16>
    %16 = vector.shape_cast %15 : vector<1x1x32x16xbf16> to vector<32x16xbf16>
    %cst_15 = arith.constant dense<0.000000e+00> : vector<8x16xf32>
    %17 = tpu.matmul %8, %16, %cst_15 {dimension_numbers = #tpu.dot_dimension_numbers<[1], [0], [0], [1], [0, 0, 1, 1], [], []>} : vector<8x32xbf16>, vector<32x16xbf16>, vector<8x16xf32> -> vector<8x16xf32>
    %cst_16 = arith.constant 2.500000e-01 : f32
    %18 = vector.broadcast %cst_16 : f32 to vector<8x16xf32>
    %19 = arith.mulf %11, %18 : vector<8x16xf32>
    %20 = arith.truncf %19 : vector<8x16xf32> to vector<8x16xbf16>
    %21 = arith.truncf %14 : vector<8x16xf32> to vector<8x16xbf16>
    %cst_17 = arith.constant dense<0.000000e+00> : vector<8x8xf32>
    %22 = tpu.matmul %20, %21, %cst_17 {dimension_numbers = #tpu.dot_dimension_numbers<[1], [1], [0], [0], [0, 0, 1, 0], [], []>} : vector<8x16xbf16>, vector<8x16xbf16>, vector<8x8xf32> -> vector<8x8xf32>
    %23 = arith.addf %22, %5 : vector<8x8xf32>
    %cst_18 = arith.constant dense<0xFF800000> : vector<8xf32>
    %24 = vector.multi_reduction <maximumf>, %23, %cst_18 [1] : vector<8x8xf32> to vector<8xf32>
    %25 = vector.shape_cast %24 : vector<8xf32> to vector<8x1xf32>
    %26 = vector.broadcast %25 : vector<8x1xf32> to vector<8x8xf32>
    %27 = arith.subf %23, %26 : vector<8x8xf32>
    %28 = math.exp %27 : vector<8x8xf32>
    %cst_19 = arith.constant dense<0.000000e+00> : vector<8xf32>
    %29 = vector.multi_reduction <add>, %28, %cst_19 [1] : vector<8x8xf32> to vector<8xf32>
    %30 = vector.shape_cast %29 : vector<8xf32> to vector<8x1xf32>
    %31 = vector.broadcast %30 : vector<8x1xf32> to vector<8x8xf32>
    %32 = arith.divf %28, %31 : vector<8x8xf32>
    %33 = arith.truncf %32 : vector<8x8xf32> to vector<8x8xbf16>
    %34 = arith.truncf %17 : vector<8x16xf32> to vector<8x16xbf16>
    %cst_20 = arith.constant dense<0.000000e+00> : vector<8x16xf32>
    %35 = tpu.matmul %33, %34, %cst_20 {dimension_numbers = #tpu.dot_dimension_numbers<[1], [0], [0], [1], [0, 0, 1, 1], [], []>} : vector<8x8xbf16>, vector<8x16xbf16>, vector<8x16xf32> -> vector<8x16xf32>
    %c0_21 = arith.constant 0 : index
    %c0_22 = arith.constant 0 : index
    %c0_23 = arith.constant 0 : index
    %36 = vector.load %arg3[%c0_21, %c0_22, %c0_23] : memref<2x8x64xf32, #tpu.memory_space<vmem>>, vector<1x8x16xf32>
    %37 = vector.shape_cast %36 : vector<1x8x16xf32> to vector<8x16xf32>
    %38 = vector.shape_cast %35 : vector<8x16xf32> to vector<1x8x16xf32>
    tpu.vector_store %arg3[%c0_21, %c0_22, %c0_23], %38 {strides = array<i32>} : memref<2x8x64xf32, #tpu.memory_space<vmem>>, vector<1x8x16xf32>,
    %c0_24 = arith.constant 0 : index
    %c1_25 = arith.constant 1 : index
    %c0_26 = arith.constant 0 : index
    %c0_27 = arith.constant 0 : index
    %39 = vector.load %arg2[%c0_24, %c1_25, %c0_26, %c0_27] : memref<3x4x32x16xbf16, #tpu.memory_space<vmem>>, vector<1x1x32x16xbf16>
    %40 = vector.shape_cast %39 : vector<1x1x32x16xbf16> to vector<32x16xbf16>
    %cst_28 = arith.constant dense<0.000000e+00> : vector<8x16xf32>
    %41 = tpu.matmul %8, %40, %cst_28 {dimension_numbers = #tpu.dot_dimension_numbers<[1], [0], [0], [1], [0, 0, 1, 1], [], []>} : vector<8x32xbf16>, vector<32x16xbf16>, vector<8x16xf32> -> vector<8x16xf32>
    %c1_29 = arith.constant 1 : index
    %c1_30 = arith.constant 1 : index
    %c0_31 = arith.constant 0 : index
    %c0_32 = arith.constant 0 : index
    %42 = vector.load %arg2[%c1_29, %c1_30, %c0_31, %c0_32] : memref<3x4x32x16xbf16, #tpu.memory_space<vmem>>, vector<1x1x32x16xbf16>
    %43 = vector.shape_cast %42 : vector<1x1x32x16xbf16> to vector<32x16xbf16>
    %cst_33 = arith.constant dense<0.000000e+00> : vector<8x16xf32>
    %44 = tpu.matmul %8, %43, %cst_33 {dimension_numbers = #tpu.dot_dimension_numbers<[1], [0], [0], [1], [0, 0, 1, 1], [], []>} : vector<8x32xbf16>, vector<32x16xbf16>, vector<8x16xf32> -> vector<8x16xf32>
    %c2_34 = arith.constant 2 : index
    %c1_35 = arith.constant 1 : index
    %c0_36 = arith.constant 0 : index
    %c0_37 = arith.constant 0 : index
    %45 = vector.load %arg2[%c2_34, %c1_35, %c0_36, %c0_37] : memref<3x4x32x16xbf16, #tpu.memory_space<vmem>>, vector<1x1x32x16xbf16>
    %46 = vector.shape_cast %45 : vector<1x1x32x16xbf16> to vector<32x16xbf16>
    %cst_38 = arith.constant dense<0.000000e+00> : vector<8x16xf32>
    %47 = tpu.matmul %8, %46, %cst_38 {dimension_numbers = #tpu.dot_dimension_numbers<[1], [0], [0], [1], [0, 0, 1, 1], [], []>} : vector<8x32xbf16>, vector<32x16xbf16>, vector<8x16xf32> -> vector<8x16xf32>
    %cst_39 = arith.constant 2.500000e-01 : f32
    %48 = vector.broadcast %cst_39 : f32 to vector<8x16xf32>
    %49 = arith.mulf %41, %48 : vector<8x16xf32>
    %50 = arith.truncf %49 : vector<8x16xf32> to vector<8x16xbf16>
    %51 = arith.truncf %44 : vector<8x16xf32> to vector<8x16xbf16>
    %cst_40 = arith.constant dense<0.000000e+00> : vector<8x8xf32>
    %52 = tpu.matmul %50, %51, %cst_40 {dimension_numbers = #tpu.dot_dimension_numbers<[1], [1], [0], [0], [0, 0, 1, 0], [], []>} : vector<8x16xbf16>, vector<8x16xbf16>, vector<8x8xf32> -> vector<8x8xf32>
    %53 = arith.addf %52, %5 : vector<8x8xf32>
    %cst_41 = arith.constant dense<0xFF800000> : vector<8xf32>
    %54 = vector.multi_reduction <maximumf>, %53, %cst_41 [1] : vector<8x8xf32> to vector<8xf32>
    %55 = vector.shape_cast %54 : vector<8xf32> to vector<8x1xf32>
    %56 = vector.broadcast %55 : vector<8x1xf32> to vector<8x8xf32>
    %57 = arith.subf %53, %56 : vector<8x8xf32>
    %58 = math.exp %57 : vector<8x8xf32>
    %cst_42 = arith.constant dense<0.000000e+00> : vector<8xf32>
    %59 = vector.multi_reduction <add>, %58, %cst_42 [1] : vector<8x8xf32> to vector<8xf32>
    %60 = vector.shape_cast %59 : vector<8xf32> to vector<8x1xf32>
    %61 = vector.broadcast %60 : vector<8x1xf32> to vector<8x8xf32>
    %62 = arith.divf %58, %61 : vector<8x8xf32>
    %63 = arith.truncf %62 : vector<8x8xf32> to vector<8x8xbf16>
    %64 = arith.truncf %47 : vector<8x16xf32> to vector<8x16xbf16>
    %cst_43 = arith.constant dense<0.000000e+00> : vector<8x16xf32>
    %65 = tpu.matmul %63, %64, %cst_43 {dimension_numbers = #tpu.dot_dimension_numbers<[1], [0], [0], [1], [0, 0, 1, 1], [], []>} : vector<8x8xbf16>, vector<8x16xbf16>, vector<8x16xf32> -> vector<8x16xf32>
    %c0_44 = arith.constant 0 : index
    %c0_45 = arith.constant 0 : index
    %c16 = arith.constant 16 : index
    %66 = vector.load %arg3[%c0_44, %c0_45, %c16] : memref<2x8x64xf32, #tpu.memory_space<vmem>>, vector<1x8x16xf32>
    %67 = vector.shape_cast %66 : vector<1x8x16xf32> to vector<8x16xf32>
    %68 = vector.shape_cast %65 : vector<8x16xf32> to vector<1x8x16xf32>
    tpu.vector_store %arg3[%c0_44, %c0_45, %c16], %68 {strides = array<i32>} : memref<2x8x64xf32, #tpu.memory_space<vmem>>, vector<1x8x16xf32>,
    %c0_46 = arith.constant 0 : index
    %c2_47 = arith.constant 2 : index
    %c0_48 = arith.constant 0 : index
    %c0_49 = arith.constant 0 : index
    %69 = vector.load %arg2[%c0_46, %c2_47, %c0_48, %c0_49] : memref<3x4x32x16xbf16, #tpu.memory_space<vmem>>, vector<1x1x32x16xbf16>
    %70 = vector.shape_cast %69 : vector<1x1x32x16xbf16> to vector<32x16xbf16>
    %cst_50 = arith.constant dense<0.000000e+00> : vector<8x16xf32>
    %71 = tpu.matmul %8, %70, %cst_50 {dimension_numbers = #tpu.dot_dimension_numbers<[1], [0], [0], [1], [0, 0, 1, 1], [], []>} : vector<8x32xbf16>, vector<32x16xbf16>, vector<8x16xf32> -> vector<8x16xf32>
    %c1_51 = arith.constant 1 : index
    %c2_52 = arith.constant 2 : index
    %c0_53 = arith.constant 0 : index
    %c0_54 = arith.constant 0 : index
    %72 = vector.load %arg2[%c1_51, %c2_52, %c0_53, %c0_54] : memref<3x4x32x16xbf16, #tpu.memory_space<vmem>>, vector<1x1x32x16xbf16>
    %73 = vector.shape_cast %72 : vector<1x1x32x16xbf16> to vector<32x16xbf16>
    %cst_55 = arith.constant dense<0.000000e+00> : vector<8x16xf32>
    %74 = tpu.matmul %8, %73, %cst_55 {dimension_numbers = #tpu.dot_dimension_numbers<[1], [0], [0], [1], [0, 0, 1, 1], [], []>} : vector<8x32xbf16>, vector<32x16xbf16>, vector<8x16xf32> -> vector<8x16xf32>
    %c2_56 = arith.constant 2 : index
    %c2_57 = arith.constant 2 : index
    %c0_58 = arith.constant 0 : index
    %c0_59 = arith.constant 0 : index
    %75 = vector.load %arg2[%c2_56, %c2_57, %c0_58, %c0_59] : memref<3x4x32x16xbf16, #tpu.memory_space<vmem>>, vector<1x1x32x16xbf16>
    %76 = vector.shape_cast %75 : vector<1x1x32x16xbf16> to vector<32x16xbf16>
    %cst_60 = arith.constant dense<0.000000e+00> : vector<8x16xf32>
    %77 = tpu.matmul %8, %76, %cst_60 {dimension_numbers = #tpu.dot_dimension_numbers<[1], [0], [0], [1], [0, 0, 1, 1], [], []>} : vector<8x32xbf16>, vector<32x16xbf16>, vector<8x16xf32> -> vector<8x16xf32>
    %cst_61 = arith.constant 2.500000e-01 : f32
    %78 = vector.broadcast %cst_61 : f32 to vector<8x16xf32>
    %79 = arith.mulf %71, %78 : vector<8x16xf32>
    %80 = arith.truncf %79 : vector<8x16xf32> to vector<8x16xbf16>
    %81 = arith.truncf %74 : vector<8x16xf32> to vector<8x16xbf16>
    %cst_62 = arith.constant dense<0.000000e+00> : vector<8x8xf32>
    %82 = tpu.matmul %80, %81, %cst_62 {dimension_numbers = #tpu.dot_dimension_numbers<[1], [1], [0], [0], [0, 0, 1, 0], [], []>} : vector<8x16xbf16>, vector<8x16xbf16>, vector<8x8xf32> -> vector<8x8xf32>
    %83 = arith.addf %82, %5 : vector<8x8xf32>
    %cst_63 = arith.constant dense<0xFF800000> : vector<8xf32>
    %84 = vector.multi_reduction <maximumf>, %83, %cst_63 [1] : vector<8x8xf32> to vector<8xf32>
    %85 = vector.shape_cast %84 : vector<8xf32> to vector<8x1xf32>
    %86 = vector.broadcast %85 : vector<8x1xf32> to vector<8x8xf32>
    %87 = arith.subf %83, %86 : vector<8x8xf32>
    %88 = math.exp %87 : vector<8x8xf32>
    %cst_64 = arith.constant dense<0.000000e+00> : vector<8xf32>
    %89 = vector.multi_reduction <add>, %88, %cst_64 [1] : vector<8x8xf32> to vector<8xf32>
    %90 = vector.shape_cast %89 : vector<8xf32> to vector<8x1xf32>
    %91 = vector.broadcast %90 : vector<8x1xf32> to vector<8x8xf32>
    %92 = arith.divf %88, %91 : vector<8x8xf32>
    %93 = arith.truncf %92 : vector<8x8xf32> to vector<8x8xbf16>
    %94 = arith.truncf %77 : vector<8x16xf32> to vector<8x16xbf16>
    %cst_65 = arith.constant dense<0.000000e+00> : vector<8x16xf32>
    %95 = tpu.matmul %93, %94, %cst_65 {dimension_numbers = #tpu.dot_dimension_numbers<[1], [0], [0], [1], [0, 0, 1, 1], [], []>} : vector<8x8xbf16>, vector<8x16xbf16>, vector<8x16xf32> -> vector<8x16xf32>
    %c0_66 = arith.constant 0 : index
    %c0_67 = arith.constant 0 : index
    %c32 = arith.constant 32 : index
    %96 = vector.load %arg3[%c0_66, %c0_67, %c32] : memref<2x8x64xf32, #tpu.memory_space<vmem>>, vector<1x8x16xf32>
    %97 = vector.shape_cast %96 : vector<1x8x16xf32> to vector<8x16xf32>
    %98 = vector.shape_cast %95 : vector<8x16xf32> to vector<1x8x16xf32>
    tpu.vector_store %arg3[%c0_66, %c0_67, %c32], %98 {strides = array<i32>} : memref<2x8x64xf32, #tpu.memory_space<vmem>>, vector<1x8x16xf32>,
    %c0_68 = arith.constant 0 : index
    %c3 = arith.constant 3 : index
    %c0_69 = arith.constant 0 : index
    %c0_70 = arith.constant 0 : index
    %99 = vector.load %arg2[%c0_68, %c3, %c0_69, %c0_70] : memref<3x4x32x16xbf16, #tpu.memory_space<vmem>>, vector<1x1x32x16xbf16>
    %100 = vector.shape_cast %99 : vector<1x1x32x16xbf16> to vector<32x16xbf16>
    %cst_71 = arith.constant dense<0.000000e+00> : vector<8x16xf32>
    %101 = tpu.matmul %8, %100, %cst_71 {dimension_numbers = #tpu.dot_dimension_numbers<[1], [0], [0], [1], [0, 0, 1, 1], [], []>} : vector<8x32xbf16>, vector<32x16xbf16>, vector<8x16xf32> -> vector<8x16xf32>
    %c1_72 = arith.constant 1 : index
    %c3_73 = arith.constant 3 : index
    %c0_74 = arith.constant 0 : index
    %c0_75 = arith.constant 0 : index
    %102 = vector.load %arg2[%c1_72, %c3_73, %c0_74, %c0_75] : memref<3x4x32x16xbf16, #tpu.memory_space<vmem>>, vector<1x1x32x16xbf16>
    %103 = vector.shape_cast %102 : vector<1x1x32x16xbf16> to vector<32x16xbf16>
    %cst_76 = arith.constant dense<0.000000e+00> : vector<8x16xf32>
    %104 = tpu.matmul %8, %103, %cst_76 {dimension_numbers = #tpu.dot_dimension_numbers<[1], [0], [0], [1], [0, 0, 1, 1], [], []>} : vector<8x32xbf16>, vector<32x16xbf16>, vector<8x16xf32> -> vector<8x16xf32>
    %c2_77 = arith.constant 2 : index
    %c3_78 = arith.constant 3 : index
    %c0_79 = arith.constant 0 : index
    %c0_80 = arith.constant 0 : index
    %105 = vector.load %arg2[%c2_77, %c3_78, %c0_79, %c0_80] : memref<3x4x32x16xbf16, #tpu.memory_space<vmem>>, vector<1x1x32x16xbf16>
    %106 = vector.shape_cast %105 : vector<1x1x32x16xbf16> to vector<32x16xbf16>
    %cst_81 = arith.constant dense<0.000000e+00> : vector<8x16xf32>
    %107 = tpu.matmul %8, %106, %cst_81 {dimension_numbers = #tpu.dot_dimension_numbers<[1], [0], [0], [1], [0, 0, 1, 1], [], []>} : vector<8x32xbf16>, vector<32x16xbf16>, vector<8x16xf32> -> vector<8x16xf32>
    %cst_82 = arith.constant 2.500000e-01 : f32
    %108 = vector.broadcast %cst_82 : f32 to vector<8x16xf32>
    %109 = arith.mulf %101, %108 : vector<8x16xf32>
    %110 = arith.truncf %109 : vector<8x16xf32> to vector<8x16xbf16>
    %111 = arith.truncf %104 : vector<8x16xf32> to vector<8x16xbf16>
    %cst_83 = arith.constant dense<0.000000e+00> : vector<8x8xf32>
    %112 = tpu.matmul %110, %111, %cst_83 {dimension_numbers = #tpu.dot_dimension_numbers<[1], [1], [0], [0], [0, 0, 1, 0], [], []>} : vector<8x16xbf16>, vector<8x16xbf16>, vector<8x8xf32> -> vector<8x8xf32>
    %113 = arith.addf %112, %5 : vector<8x8xf32>
    %cst_84 = arith.constant dense<0xFF800000> : vector<8xf32>
    %114 = vector.multi_reduction <maximumf>, %113, %cst_84 [1] : vector<8x8xf32> to vector<8xf32>
    %115 = vector.shape_cast %114 : vector<8xf32> to vector<8x1xf32>
    %116 = vector.broadcast %115 : vector<8x1xf32> to vector<8x8xf32>
    %117 = arith.subf %113, %116 : vector<8x8xf32>
    %118 = math.exp %117 : vector<8x8xf32>
    %cst_85 = arith.constant dense<0.000000e+00> : vector<8xf32>
    %119 = vector.multi_reduction <add>, %118, %cst_85 [1] : vector<8x8xf32> to vector<8xf32>
    %120 = vector.shape_cast %119 : vector<8xf32> to vector<8x1xf32>
    %121 = vector.broadcast %120 : vector<8x1xf32> to vector<8x8xf32>
    %122 = arith.divf %118, %121 : vector<8x8xf32>
    %123 = arith.truncf %122 : vector<8x8xf32> to vector<8x8xbf16>
    %124 = arith.truncf %107 : vector<8x16xf32> to vector<8x16xbf16>
    %cst_86 = arith.constant dense<0.000000e+00> : vector<8x16xf32>
    %125 = tpu.matmul %123, %124, %cst_86 {dimension_numbers = #tpu.dot_dimension_numbers<[1], [0], [0], [1], [0, 0, 1, 1], [], []>} : vector<8x8xbf16>, vector<8x16xbf16>, vector<8x16xf32> -> vector<8x16xf32>
    %c0_87 = arith.constant 0 : index
    %c0_88 = arith.constant 0 : index
    %c48 = arith.constant 48 : index
    %126 = vector.load %arg3[%c0_87, %c0_88, %c48] : memref<2x8x64xf32, #tpu.memory_space<vmem>>, vector<1x8x16xf32>
    %127 = vector.shape_cast %126 : vector<1x8x16xf32> to vector<8x16xf32>
    %128 = vector.shape_cast %125 : vector<8x16xf32> to vector<1x8x16xf32>
    tpu.vector_store %arg3[%c0_87, %c0_88, %c48], %128 {strides = array<i32>} : memref<2x8x64xf32, #tpu.memory_space<vmem>>, vector<1x8x16xf32>,
    %c1_89 = arith.constant 1 : index
    %c0_90 = arith.constant 0 : index
    %c0_91 = arith.constant 0 : index
    %129 = vector.load %arg1[%c1_89, %c0_90, %c0_91] : memref<2x8x32xf32, #tpu.memory_space<vmem>>, vector<1x8x32xf32>
    %130 = vector.shape_cast %129 : vector<1x8x32xf32> to vector<8x32xf32>
    %131 = arith.truncf %130 : vector<8x32xf32> to vector<8x32xbf16>
    %c0_92 = arith.constant 0 : index
    %c0_93 = arith.constant 0 : index
    %c0_94 = arith.constant 0 : index
    %c0_95 = arith.constant 0 : index
    %132 = vector.load %arg2[%c0_92, %c0_93, %c0_94, %c0_95] : memref<3x4x32x16xbf16, #tpu.memory_space<vmem>>, vector<1x1x32x16xbf16>
    %133 = vector.shape_cast %132 : vector<1x1x32x16xbf16> to vector<32x16xbf16>
    %cst_96 = arith.constant dense<0.000000e+00> : vector<8x16xf32>
    %134 = tpu.matmul %131, %133, %cst_96 {dimension_numbers = #tpu.dot_dimension_numbers<[1], [0], [0], [1], [0, 0, 1, 1], [], []>} : vector<8x32xbf16>, vector<32x16xbf16>, vector<8x16xf32> -> vector<8x16xf32>
    %c1_97 = arith.constant 1 : index
    %c0_98 = arith.constant 0 : index
    %c0_99 = arith.constant 0 : index
    %c0_100 = arith.constant 0 : index
    %135 = vector.load %arg2[%c1_97, %c0_98, %c0_99, %c0_100] : memref<3x4x32x16xbf16, #tpu.memory_space<vmem>>, vector<1x1x32x16xbf16>
    %136 = vector.shape_cast %135 : vector<1x1x32x16xbf16> to vector<32x16xbf16>
    %cst_101 = arith.constant dense<0.000000e+00> : vector<8x16xf32>
    %137 = tpu.matmul %131, %136, %cst_101 {dimension_numbers = #tpu.dot_dimension_numbers<[1], [0], [0], [1], [0, 0, 1, 1], [], []>} : vector<8x32xbf16>, vector<32x16xbf16>, vector<8x16xf32> -> vector<8x16xf32>
    %c2_102 = arith.constant 2 : index
    %c0_103 = arith.constant 0 : index
    %c0_104 = arith.constant 0 : index
    %c0_105 = arith.constant 0 : index
    %138 = vector.load %arg2[%c2_102, %c0_103, %c0_104, %c0_105] : memref<3x4x32x16xbf16, #tpu.memory_space<vmem>>, vector<1x1x32x16xbf16>
    %139 = vector.shape_cast %138 : vector<1x1x32x16xbf16> to vector<32x16xbf16>
    %cst_106 = arith.constant dense<0.000000e+00> : vector<8x16xf32>
    %140 = tpu.matmul %131, %139, %cst_106 {dimension_numbers = #tpu.dot_dimension_numbers<[1], [0], [0], [1], [0, 0, 1, 1], [], []>} : vector<8x32xbf16>, vector<32x16xbf16>, vector<8x16xf32> -> vector<8x16xf32>
    %cst_107 = arith.constant 2.500000e-01 : f32
    %141 = vector.broadcast %cst_107 : f32 to vector<8x16xf32>
    %142 = arith.mulf %134, %141 : vector<8x16xf32>
    %143 = arith.truncf %142 : vector<8x16xf32> to vector<8x16xbf16>
    %144 = arith.truncf %137 : vector<8x16xf32> to vector<8x16xbf16>
    %cst_108 = arith.constant dense<0.000000e+00> : vector<8x8xf32>
    %145 = tpu.matmul %143, %144, %cst_108 {dimension_numbers = #tpu.dot_dimension_numbers<[1], [1], [0], [0], [0, 0, 1, 0], [], []>} : vector<8x16xbf16>, vector<8x16xbf16>, vector<8x8xf32> -> vector<8x8xf32>
    %146 = arith.addf %145, %5 : vector<8x8xf32>
    %cst_109 = arith.constant dense<0xFF800000> : vector<8xf32>
    %147 = vector.multi_reduction <maximumf>, %146, %cst_109 [1] : vector<8x8xf32> to vector<8xf32>
    %148 = vector.shape_cast %147 : vector<8xf32> to vector<8x1xf32>
    %149 = vector.broadcast %148 : vector<8x1xf32> to vector<8x8xf32>
    %150 = arith.subf %146, %149 : vector<8x8xf32>
    %151 = math.exp %150 : vector<8x8xf32>
    %cst_110 = arith.constant dense<0.000000e+00> : vector<8xf32>
    %152 = vector.multi_reduction <add>, %151, %cst_110 [1] : vector<8x8xf32> to vector<8xf32>
    %153 = vector.shape_cast %152 : vector<8xf32> to vector<8x1xf32>
    %154 = vector.broadcast %153 : vector<8x1xf32> to vector<8x8xf32>
    %155 = arith.divf %151, %154 : vector<8x8xf32>
    %156 = arith.truncf %155 : vector<8x8xf32> to vector<8x8xbf16>
    %157 = arith.truncf %140 : vector<8x16xf32> to vector<8x16xbf16>
    %cst_111 = arith.constant dense<0.000000e+00> : vector<8x16xf32>
    %158 = tpu.matmul %156, %157, %cst_111 {dimension_numbers = #tpu.dot_dimension_numbers<[1], [0], [0], [1], [0, 0, 1, 1], [], []>} : vector<8x8xbf16>, vector<8x16xbf16>, vector<8x16xf32> -> vector<8x16xf32>
    %c1_112 = arith.constant 1 : index
    %c0_113 = arith.constant 0 : index
    %c0_114 = arith.constant 0 : index
    %159 = vector.load %arg3[%c1_112, %c0_113, %c0_114] : memref<2x8x64xf32, #tpu.memory_space<vmem>>, vector<1x8x16xf32>
    %160 = vector.shape_cast %159 : vector<1x8x16xf32> to vector<8x16xf32>
    %161 = vector.shape_cast %158 : vector<8x16xf32> to vector<1x8x16xf32>
    tpu.vector_store %arg3[%c1_112, %c0_113, %c0_114], %161 {strides = array<i32>} : memref<2x8x64xf32, #tpu.memory_space<vmem>>, vector<1x8x16xf32>,
    %c0_115 = arith.constant 0 : index
    %c1_116 = arith.constant 1 : index
    %c0_117 = arith.constant 0 : index
    %c0_118 = arith.constant 0 : index
    %162 = vector.load %arg2[%c0_115, %c1_116, %c0_117, %c0_118] : memref<3x4x32x16xbf16, #tpu.memory_space<vmem>>, vector<1x1x32x16xbf16>
    %163 = vector.shape_cast %162 : vector<1x1x32x16xbf16> to vector<32x16xbf16>
    %cst_119 = arith.constant dense<0.000000e+00> : vector<8x16xf32>
    %164 = tpu.matmul %131, %163, %cst_119 {dimension_numbers = #tpu.dot_dimension_numbers<[1], [0], [0], [1], [0, 0, 1, 1], [], []>} : vector<8x32xbf16>, vector<32x16xbf16>, vector<8x16xf32> -> vector<8x16xf32>
    %c1_120 = arith.constant 1 : index
    %c1_121 = arith.constant 1 : index
    %c0_122 = arith.constant 0 : index
    %c0_123 = arith.constant 0 : index
    %165 = vector.load %arg2[%c1_120, %c1_121, %c0_122, %c0_123] : memref<3x4x32x16xbf16, #tpu.memory_space<vmem>>, vector<1x1x32x16xbf16>
    %166 = vector.shape_cast %165 : vector<1x1x32x16xbf16> to vector<32x16xbf16>
    %cst_124 = arith.constant dense<0.000000e+00> : vector<8x16xf32>
    %167 = tpu.matmul %131, %166, %cst_124 {dimension_numbers = #tpu.dot_dimension_numbers<[1], [0], [0], [1], [0, 0, 1, 1], [], []>} : vector<8x32xbf16>, vector<32x16xbf16>, vector<8x16xf32> -> vector<8x16xf32>
    %c2_125 = arith.constant 2 : index
    %c1_126 = arith.constant 1 : index
    %c0_127 = arith.constant 0 : index
    %c0_128 = arith.constant 0 : index
    %168 = vector.load %arg2[%c2_125, %c1_126, %c0_127, %c0_128] : memref<3x4x32x16xbf16, #tpu.memory_space<vmem>>, vector<1x1x32x16xbf16>
    %169 = vector.shape_cast %168 : vector<1x1x32x16xbf16> to vector<32x16xbf16>
    %cst_129 = arith.constant dense<0.000000e+00> : vector<8x16xf32>
    %170 = tpu.matmul %131, %169, %cst_129 {dimension_numbers = #tpu.dot_dimension_numbers<[1], [0], [0], [1], [0, 0, 1, 1], [], []>} : vector<8x32xbf16>, vector<32x16xbf16>, vector<8x16xf32> -> vector<8x16xf32>
    %cst_130 = arith.constant 2.500000e-01 : f32
    %171 = vector.broadcast %cst_130 : f32 to vector<8x16xf32>
    %172 = arith.mulf %164, %171 : vector<8x16xf32>
    %173 = arith.truncf %172 : vector<8x16xf32> to vector<8x16xbf16>
    %174 = arith.truncf %167 : vector<8x16xf32> to vector<8x16xbf16>
    %cst_131 = arith.constant dense<0.000000e+00> : vector<8x8xf32>
    %175 = tpu.matmul %173, %174, %cst_131 {dimension_numbers = #tpu.dot_dimension_numbers<[1], [1], [0], [0], [0, 0, 1, 0], [], []>} : vector<8x16xbf16>, vector<8x16xbf16>, vector<8x8xf32> -> vector<8x8xf32>
    %176 = arith.addf %175, %5 : vector<8x8xf32>
    %cst_132 = arith.constant dense<0xFF800000> : vector<8xf32>
    %177 = vector.multi_reduction <maximumf>, %176, %cst_132 [1] : vector<8x8xf32> to vector<8xf32>
    %178 = vector.shape_cast %177 : vector<8xf32> to vector<8x1xf32>
    %179 = vector.broadcast %178 : vector<8x1xf32> to vector<8x8xf32>
    %180 = arith.subf %176, %179 : vector<8x8xf32>
    %181 = math.exp %180 : vector<8x8xf32>
    %cst_133 = arith.constant dense<0.000000e+00> : vector<8xf32>
    %182 = vector.multi_reduction <add>, %181, %cst_133 [1] : vector<8x8xf32> to vector<8xf32>
    %183 = vector.shape_cast %182 : vector<8xf32> to vector<8x1xf32>
    %184 = vector.broadcast %183 : vector<8x1xf32> to vector<8x8xf32>
    %185 = arith.divf %181, %184 : vector<8x8xf32>
    %186 = arith.truncf %185 : vector<8x8xf32> to vector<8x8xbf16>
    %187 = arith.truncf %170 : vector<8x16xf32> to vector<8x16xbf16>
    %cst_134 = arith.constant dense<0.000000e+00> : vector<8x16xf32>
    %188 = tpu.matmul %186, %187, %cst_134 {dimension_numbers = #tpu.dot_dimension_numbers<[1], [0], [0], [1], [0, 0, 1, 1], [], []>} : vector<8x8xbf16>, vector<8x16xbf16>, vector<8x16xf32> -> vector<8x16xf32>
    %c1_135 = arith.constant 1 : index
    %c0_136 = arith.constant 0 : index
    %c16_137 = arith.constant 16 : index
    %189 = vector.load %arg3[%c1_135, %c0_136, %c16_137] : memref<2x8x64xf32, #tpu.memory_space<vmem>>, vector<1x8x16xf32>
    %190 = vector.shape_cast %189 : vector<1x8x16xf32> to vector<8x16xf32>
    %191 = vector.shape_cast %188 : vector<8x16xf32> to vector<1x8x16xf32>
    tpu.vector_store %arg3[%c1_135, %c0_136, %c16_137], %191 {strides = array<i32>} : memref<2x8x64xf32, #tpu.memory_space<vmem>>, vector<1x8x16xf32>,
    %c0_138 = arith.constant 0 : index
    %c2_139 = arith.constant 2 : index
    %c0_140 = arith.constant 0 : index
    %c0_141 = arith.constant 0 : index
    %192 = vector.load %arg2[%c0_138, %c2_139, %c0_140, %c0_141] : memref<3x4x32x16xbf16, #tpu.memory_space<vmem>>, vector<1x1x32x16xbf16>
    %193 = vector.shape_cast %192 : vector<1x1x32x16xbf16> to vector<32x16xbf16>
    %cst_142 = arith.constant dense<0.000000e+00> : vector<8x16xf32>
    %194 = tpu.matmul %131, %193, %cst_142 {dimension_numbers = #tpu.dot_dimension_numbers<[1], [0], [0], [1], [0, 0, 1, 1], [], []>} : vector<8x32xbf16>, vector<32x16xbf16>, vector<8x16xf32> -> vector<8x16xf32>
    %c1_143 = arith.constant 1 : index
    %c2_144 = arith.constant 2 : index
    %c0_145 = arith.constant 0 : index
    %c0_146 = arith.constant 0 : index
    %195 = vector.load %arg2[%c1_143, %c2_144, %c0_145, %c0_146] : memref<3x4x32x16xbf16, #tpu.memory_space<vmem>>, vector<1x1x32x16xbf16>
    %196 = vector.shape_cast %195 : vector<1x1x32x16xbf16> to vector<32x16xbf16>
    %cst_147 = arith.constant dense<0.000000e+00> : vector<8x16xf32>
    %197 = tpu.matmul %131, %196, %cst_147 {dimension_numbers = #tpu.dot_dimension_numbers<[1], [0], [0], [1], [0, 0, 1, 1], [], []>} : vector<8x32xbf16>, vector<32x16xbf16>, vector<8x16xf32> -> vector<8x16xf32>
    %c2_148 = arith.constant 2 : index
    %c2_149 = arith.constant 2 : index
    %c0_150 = arith.constant 0 : index
    %c0_151 = arith.constant 0 : index
    %198 = vector.load %arg2[%c2_148, %c2_149, %c0_150, %c0_151] : memref<3x4x32x16xbf16, #tpu.memory_space<vmem>>, vector<1x1x32x16xbf16>
    %199 = vector.shape_cast %198 : vector<1x1x32x16xbf16> to vector<32x16xbf16>
    %cst_152 = arith.constant dense<0.000000e+00> : vector<8x16xf32>
    %200 = tpu.matmul %131, %199, %cst_152 {dimension_numbers = #tpu.dot_dimension_numbers<[1], [0], [0], [1], [0, 0, 1, 1], [], []>} : vector<8x32xbf16>, vector<32x16xbf16>, vector<8x16xf32> -> vector<8x16xf32>
    %cst_153 = arith.constant 2.500000e-01 : f32
    %201 = vector.broadcast %cst_153 : f32 to vector<8x16xf32>
    %202 = arith.mulf %194, %201 : vector<8x16xf32>
    %203 = arith.truncf %202 : vector<8x16xf32> to vector<8x16xbf16>
    %204 = arith.truncf %197 : vector<8x16xf32> to vector<8x16xbf16>
    %cst_154 = arith.constant dense<0.000000e+00> : vector<8x8xf32>
    %205 = tpu.matmul %203, %204, %cst_154 {dimension_numbers = #tpu.dot_dimension_numbers<[1], [1], [0], [0], [0, 0, 1, 0], [], []>} : vector<8x16xbf16>, vector<8x16xbf16>, vector<8x8xf32> -> vector<8x8xf32>
    %206 = arith.addf %205, %5 : vector<8x8xf32>
    %cst_155 = arith.constant dense<0xFF800000> : vector<8xf32>
    %207 = vector.multi_reduction <maximumf>, %206, %cst_155 [1] : vector<8x8xf32> to vector<8xf32>
    %208 = vector.shape_cast %207 : vector<8xf32> to vector<8x1xf32>
    %209 = vector.broadcast %208 : vector<8x1xf32> to vector<8x8xf32>
    %210 = arith.subf %206, %209 : vector<8x8xf32>
    %211 = math.exp %210 : vector<8x8xf32>
    %cst_156 = arith.constant dense<0.000000e+00> : vector<8xf32>
    %212 = vector.multi_reduction <add>, %211, %cst_156 [1] : vector<8x8xf32> to vector<8xf32>
    %213 = vector.shape_cast %212 : vector<8xf32> to vector<8x1xf32>
    %214 = vector.broadcast %213 : vector<8x1xf32> to vector<8x8xf32>
    %215 = arith.divf %211, %214 : vector<8x8xf32>
    %216 = arith.truncf %215 : vector<8x8xf32> to vector<8x8xbf16>
    %217 = arith.truncf %200 : vector<8x16xf32> to vector<8x16xbf16>
    %cst_157 = arith.constant dense<0.000000e+00> : vector<8x16xf32>
    %218 = tpu.matmul %216, %217, %cst_157 {dimension_numbers = #tpu.dot_dimension_numbers<[1], [0], [0], [1], [0, 0, 1, 1], [], []>} : vector<8x8xbf16>, vector<8x16xbf16>, vector<8x16xf32> -> vector<8x16xf32>
    %c1_158 = arith.constant 1 : index
    %c0_159 = arith.constant 0 : index
    %c32_160 = arith.constant 32 : index
    %219 = vector.load %arg3[%c1_158, %c0_159, %c32_160] : memref<2x8x64xf32, #tpu.memory_space<vmem>>, vector<1x8x16xf32>
    %220 = vector.shape_cast %219 : vector<1x8x16xf32> to vector<8x16xf32>
    %221 = vector.shape_cast %218 : vector<8x16xf32> to vector<1x8x16xf32>
    tpu.vector_store %arg3[%c1_158, %c0_159, %c32_160], %221 {strides = array<i32>} : memref<2x8x64xf32, #tpu.memory_space<vmem>>, vector<1x8x16xf32>,
    %c0_161 = arith.constant 0 : index
    %c3_162 = arith.constant 3 : index
    %c0_163 = arith.constant 0 : index
    %c0_164 = arith.constant 0 : index
    %222 = vector.load %arg2[%c0_161, %c3_162, %c0_163, %c0_164] : memref<3x4x32x16xbf16, #tpu.memory_space<vmem>>, vector<1x1x32x16xbf16>
    %223 = vector.shape_cast %222 : vector<1x1x32x16xbf16> to vector<32x16xbf16>
    %cst_165 = arith.constant dense<0.000000e+00> : vector<8x16xf32>
    %224 = tpu.matmul %131, %223, %cst_165 {dimension_numbers = #tpu.dot_dimension_numbers<[1], [0], [0], [1], [0, 0, 1, 1], [], []>} : vector<8x32xbf16>, vector<32x16xbf16>, vector<8x16xf32> -> vector<8x16xf32>
    %c1_166 = arith.constant 1 : index
    %c3_167 = arith.constant 3 : index
    %c0_168 = arith.constant 0 : index
    %c0_169 = arith.constant 0 : index
    %225 = vector.load %arg2[%c1_166, %c3_167, %c0_168, %c0_169] : memref<3x4x32x16xbf16, #tpu.memory_space<vmem>>, vector<1x1x32x16xbf16>
    %226 = vector.shape_cast %225 : vector<1x1x32x16xbf16> to vector<32x16xbf16>
    %cst_170 = arith.constant dense<0.000000e+00> : vector<8x16xf32>
    %227 = tpu.matmul %131, %226, %cst_170 {dimension_numbers = #tpu.dot_dimension_numbers<[1], [0], [0], [1], [0, 0, 1, 1], [], []>} : vector<8x32xbf16>, vector<32x16xbf16>, vector<8x16xf32> -> vector<8x16xf32>
    %c2_171 = arith.constant 2 : index
    %c3_172 = arith.constant 3 : index
    %c0_173 = arith.constant 0 : index
    %c0_174 = arith.constant 0 : index
    %228 = vector.load %arg2[%c2_171, %c3_172, %c0_173, %c0_174] : memref<3x4x32x16xbf16, #tpu.memory_space<vmem>>, vector<1x1x32x16xbf16>
    %229 = vector.shape_cast %228 : vector<1x1x32x16xbf16> to vector<32x16xbf16>
    %cst_175 = arith.constant dense<0.000000e+00> : vector<8x16xf32>
    %230 = tpu.matmul %131, %229, %cst_175 {dimension_numbers = #tpu.dot_dimension_numbers<[1], [0], [0], [1], [0, 0, 1, 1], [], []>} : vector<8x32xbf16>, vector<32x16xbf16>, vector<8x16xf32> -> vector<8x16xf32>
    %cst_176 = arith.constant 2.500000e-01 : f32
    %231 = vector.broadcast %cst_176 : f32 to vector<8x16xf32>
    %232 = arith.mulf %224, %231 : vector<8x16xf32>
    %233 = arith.truncf %232 : vector<8x16xf32> to vector<8x16xbf16>
    %234 = arith.truncf %227 : vector<8x16xf32> to vector<8x16xbf16>
    %cst_177 = arith.constant dense<0.000000e+00> : vector<8x8xf32>
    %235 = tpu.matmul %233, %234, %cst_177 {dimension_numbers = #tpu.dot_dimension_numbers<[1], [1], [0], [0], [0, 0, 1, 0], [], []>} : vector<8x16xbf16>, vector<8x16xbf16>, vector<8x8xf32> -> vector<8x8xf32>
    %236 = arith.addf %235, %5 : vector<8x8xf32>
    %cst_178 = arith.constant dense<0xFF800000> : vector<8xf32>
    %237 = vector.multi_reduction <maximumf>, %236, %cst_178 [1] : vector<8x8xf32> to vector<8xf32>
    %238 = vector.shape_cast %237 : vector<8xf32> to vector<8x1xf32>
    %239 = vector.broadcast %238 : vector<8x1xf32> to vector<8x8xf32>
    %240 = arith.subf %236, %239 : vector<8x8xf32>
    %241 = math.exp %240 : vector<8x8xf32>
    %cst_179 = arith.constant dense<0.000000e+00> : vector<8xf32>
    %242 = vector.multi_reduction <add>, %241, %cst_179 [1] : vector<8x8xf32> to vector<8xf32>
    %243 = vector.shape_cast %242 : vector<8xf32> to vector<8x1xf32>
    %244 = vector.broadcast %243 : vector<8x1xf32> to vector<8x8xf32>
    %245 = arith.divf %241, %244 : vector<8x8xf32>
    %246 = arith.truncf %245 : vector<8x8xf32> to vector<8x8xbf16>
    %247 = arith.truncf %230 : vector<8x16xf32> to vector<8x16xbf16>
    %cst_180 = arith.constant dense<0.000000e+00> : vector<8x16xf32>
    %248 = tpu.matmul %246, %247, %cst_180 {dimension_numbers = #tpu.dot_dimension_numbers<[1], [0], [0], [1], [0, 0, 1, 1], [], []>} : vector<8x8xbf16>, vector<8x16xbf16>, vector<8x16xf32> -> vector<8x16xf32>
    %c1_181 = arith.constant 1 : index
    %c0_182 = arith.constant 0 : index
    %c48_183 = arith.constant 48 : index
    %249 = vector.load %arg3[%c1_181, %c0_182, %c48_183] : memref<2x8x64xf32, #tpu.memory_space<vmem>>, vector<1x8x16xf32>
    %250 = vector.shape_cast %249 : vector<1x8x16xf32> to vector<8x16xf32>
    %251 = vector.shape_cast %248 : vector<8x16xf32> to vector<1x8x16xf32>
    tpu.vector_store %arg3[%c1_181, %c0_182, %c48_183], %251 {strides = array<i32>} : memref<2x8x64xf32, #tpu.memory_space<vmem>>, vector<1x8x16xf32>,
    return
  }
  func.func @transform_0(%arg0: i32) -> (i32, i32, i32) {
    %c0_i32 = arith.constant 0 : i32
    %c0_i32_0 = arith.constant 0 : i32
    %c0_i32_1 = arith.constant 0 : i32
    return %arg0, %c0_i32, %c0_i32_0 : i32, i32, i32
  }
  func.func @transform_1(%arg0: i32) -> (i32, i32, i32, i32) {
    %c0_i32 = arith.constant 0 : i32
    %c0_i32_0 = arith.constant 0 : i32
    %c0_i32_1 = arith.constant 0 : i32
    %c0_i32_2 = arith.constant 0 : i32
    %c0_i32_3 = arith.constant 0 : i32
    return %c0_i32, %c0_i32_0, %c0_i32_1, %c0_i32_2 : i32, i32, i32, i32
  }
  func.func @transform_2(%arg0: i32) -> (i32, i32, i32) {
    %c0_i32 = arith.constant 0 : i32
    %c0_i32_0 = arith.constant 0 : i32
    %c0_i32_1 = arith.constant 0 : i32
    return %arg0, %c0_i32, %c0_i32_0 : i32, i32, i32
  }
}

</mosaic_0001>

<bundles_post_ra>
// kernel: tpu_custom_call.1
= control target key start
LH: loop header
LB: loop body
LE: loop exit
PB: predicated region body
PF: predicated region fallthrough
CT: control target
= control target key end

     0   :  { %v2986_v1 = vmov 0.0   ;;  %vm2987_vm0 = vmmov 0   ;;  %vm37_vm1 = vcmask 261120   ;;  %s3444_s0 = inlined_call_operand.vmem [shape: f32[2,8,32], index: 0, kind: input, shape index: {}]   ;;  %s3445_s1 = inlined_call_operand.vmem [shape: bf16[3,4,32,16], index: 1, kind: input, shape index: {}]   ;;  %s3446_s2 = inlined_call_operand.hbm [shape: f32[2,8,64], index: 2, kind: output, shape index: {}]  }
   0x1   :  { %v2882_v0 = vld [vmem:[%s3445_s1 + $0x40] sm:$0xff]   ;;  %2594 = vmatprep.subr.bf16.mxu1 %v2986_v1  ;;  %2586 = vmatprep.subr.bf16.mxu0 %v2986_v1  ;;  %v2884_v3 = vld [vmem:[%s3445_s1 + $0x48] sm:$0xff]  }
   0x2   :  { %v2883_v2 = vld [vmem:[%s3445_s1] sm:$0xff]   ;;  %2595 = vmatpush3.bf16.msra.mxu1 %v2882_v0  ;;  %2598 = vmatprep.mubr.msk.bf16.mxu1 %vm2987_vm0, %v2986_v1  ;;  %v2885_v4 = vld [vmem:[%s3445_s1 + $0x8] sm:$0xff]  }
   0x3   :  { %2587 = vmatpush3.bf16.msra.mxu0 %v2883_v2  ;;  %2596 = vmatprep.subr.bf16.mxu1 %v2986_v1  ;;  %v19_v5 = vld [vmem:[%s3444_s0] sm:$0xff] }
   0x4   :  { %2588 = vmatprep.subr.bf16.mxu0 %v2986_v1  ;;  %2590 = vmatprep.mubr.msk.bf16.mxu0 %vm2987_vm0, %v2986_v1  ;;  %v3032_v6 = vpack.c.bf16 %v19_v5, %v19_v5 }
   0x6   :  { %2597 = vmatpush3.bf16.msra.mxu1 %v2884_v3 }
   0x7   :  { %2589 = vmatpush3.bf16.msra.mxu0 %v2885_v4  ;;  %2610 = vmatprep.subr.bf16.mxu1 %v2986_v1 }
   0x8   :  { %2602 = vmatprep.subr.bf16.mxu0 %v2986_v1 }
   0x9   :  { %2599 = vmatmul.mubr.msk.bf16.vlgmr.msra.gmra.mrb[0].mxu1 %vm37_vm1, %v3032_v6 }
   0xa   :  { %2591 = vmatmul.mubr.msk.bf16.vlgmr.msra.gmra.mrb[0].mxu0 %vm37_vm1, %v3032_v6  ;;  %2612 = vmatprep.mubr.msk.bf16.mxu1 %vm2987_vm0, %v2986_v1 }
   0xb   :  { %2606 = vmatprep.mubr.msk.bf16.mxu0 %vm2987_vm0, %v2986_v1 }
   0xc   :  { %7 = vsyncpa [#allocation3], 0  ;;  %vm198_vm2 = vcmask 130048   ;;  %v2886_v19 = vld [vmem:[%s3445_s1 + $0x80] sm:$0xff]   ;;  %v2887_v20 = vld [vmem:[%s3445_s1 + $0x88] sm:$0xff]   ;;  %v13_v21 = vlaneseq  ;;  %vm245_vm4 = vcmask 64512  }
   0xd   :  { %2603 = vmatpush3.bf16.msra.mxu0 %v2886_v19  ;;  %vm262_vm5 = vcmask 1043456   ;;  %v2889_v42 = vld [vmem:[%s3445_s1 + $0x10] sm:$0xff]   ;;  %v2891_v43 = vld [vmem:[%s3445_s1 + $0x18] sm:$0xff]   ;;  %s2989_s23 = smov 32   ;;  %vm590_vm6 = vcmask 261248   ;;  %s2990_s24 = smov 48  }
   0xe   :  { %2604 = vmatprep.subr.bf16.mxu0 %v2986_v1  ;;  %v14_v22 = vshrl.u32 %v13_v21, 7  ;;  %v16_v23 = vand.u32 127, %v13_v21  ;;  %v2888_v47 = vld [vmem:[%s3445_s1 + $0x50] sm:$0xff]   ;;  %v2890_v49 = vld [vmem:[%s3445_s1 + $0x58] sm:$0xff]   ;;  %vm875_vm7 = vcmask 392448   ;;  %vm1160_vm8 = vcmask 523648  }
   0xf   :  { %v2892_v3 = vld [vmem:[%s3445_s1 + $0x90] sm:$0xff]   ;;  %v2893_v4 = vld [vmem:[%s3445_s1 + $0x98] sm:$0xff]   ;;  %s2991_s25 = smov [#allocation2]  }
  0x10   :  { %vm17_vm3 = vcmp.gt.s32.totalorder %v16_v23, %v14_v22  ;;  %v2895_v23 = vld [vmem:[%s3445_s1 + $0x20] sm:$0xff]   ;;  %s2294_s26 = sshll.u32 %s2991_s25, 4  ;;  %s2295_s26 = int_to_ptr.vmem [resolvable:$true] %s2294_s26 }
  0x11   :  { %2605 = vmatpush3.bf16.msra.mxu0 %v2887_v20  ;;  %v3062_v24 = vsel %vm17_vm3, -1e+30, %v2986_v1  ;;  %s2962_s27 = scalar_lea.vmem %s2295_s26, 256  ;;  %p2967_p1 = scmp.lt.s32.totalorder %s2295_s26, %s2295_s26 }
  0x12   :  { %2616 = vmatprep.subr.bf16.mxu0 %v2986_v1  ;;  %p2963_p0 = scmp.ne.s32.totalorder %s2295_s26, %s2962_s27  ;;  %p2968_p2 = scmp.lt.s32.totalorder %s2962_s27, %s2962_s27 }
  0x14   :  { %2607 = vmatmul.mubr.msk.bf16.vlgmr.msra.gmra.mrb[4].mxu0 %vm37_vm1, %v3032_v6  ;;  %p2969_p3 = por %p2968_p2, %p2967_p1 }
  0x15   :  { %2618 = vmatprep.mubr.msk.bf16.mxu0 %vm2987_vm0, %v2986_v1 }
  0x16   :  { %p2970_p4 = pnand %p2969_p3, %p2963_p0 }
  0xdc   :  { %v132_v7 = vpop.f32.mrb[0].mxu1 }
  0xdd   :  { %v197_v8 = vpack.c.bf16 %v132_v7, %v132_v7  ;;  %v2600_v9 = vpop.f32.mrb[1].mxu1  ;;  %v75_v10 = vpop.f32.mrb[0].mxu0 }
  0xde   :  { %v135_v11 = vpop.f32.mrb[2].mxu1  ;;  %v2592_v12 = vpop.f32.mrb[1].mxu0  ;;  %v195_v14 = vmul.f32 0.25, %v75_v10 }
  0xdf   :  { %v203_v13 = vsel %vm198_vm2, %v197_v8, 0  ;;  %v2601_v15 = vpop.f32.mrb[3].mxu1  ;;  %v78_v16 = vpop.f32.mrb[2].mxu0 }
  0xe0   :  { %2611 = vmatpush3.bf16.xpose.msra.mxu1 %v203_v13  ;;  %v2593_v17 = vpop.f32.mrb[3].mxu0  ;;  %v196_v18 = vpack.c.bf16 %v195_v14, %v195_v14 }
  0xe1   :  { %2622 = vmatprep.subr.bf16.mxu1 %v2986_v1 }
  0xe7   :  { %2613 = vmatmul.mubr.msk.bf16.vlgmr.msra.gmra.mrb[4].mxu1 %vm198_vm2, %v196_v18  ;;  %v189_v36 = vpop.f32.mrb[4].mxu0 }
  0xe8   :  { %2626 = vmatprep.mubr.msk.bf16.mxu1 %vm2987_vm0, %v2986_v1  ;;  %v2608_v37 = vpop.f32.mrb[5].mxu0  ;;  %v258_v40 = vpack.c.bf16 %v189_v36, %v189_v36  ;;  %2623 = vmatpush3.bf16.msra.mxu1 %v2889_v42 }
  0xe9   :  { %v192_v38 = vpop.f32.mrb[6].mxu0  ;;  %2624 = vmatprep.subr.bf16.mxu1 %v2986_v1 }
  0xea   :  { %v2609_v39 = vpop.f32.mrb[7].mxu0  ;;  %v264_v41 = vsel %vm262_vm5, %v258_v40, 0 }
  0xeb   :  { %2617 = vmatpush3.bf16.msra.mxu0 %v264_v41 }
  0xec   :  { %2630 = vmatprep.subr.bf16.mxu0 %v2986_v1  ;;  %2625 = vmatpush3.bf16.msra.mxu1 %v2891_v43 }
  0xed   :  { %2638 = vmatprep.subr.bf16.mxu1 %v2986_v1 }
  0xef   :  { %2627 = vmatmul.mubr.msk.bf16.vlgmr.msra.gmra.mrb[8].mxu1 %vm37_vm1, %v3032_v6 }
  0xf0   :  { %2642 = vmatprep.mubr.msk.bf16.mxu1 %vm2987_vm0, %v2986_v1  ;;  %2639 = vmatpush3.bf16.msra.mxu1 %v2892_v3 }
  0xf1   :  { %2640 = vmatprep.subr.bf16.mxu1 %v2986_v1 }
  0xf4   :  { %2641 = vmatpush3.bf16.msra.mxu1 %v2893_v4  ;;  %v2901_v4 = vld [vmem:[%s3445_s1 + $0x30] sm:$0xff]  }
  0xf5   :  { %2652 = vmatprep.subr.bf16.mxu1 %v2986_v1 }
  0xf7   :  { %2643 = vmatmul.mubr.msk.bf16.vlgmr.msra.gmra.mrb[12].mxu1 %vm37_vm1, %v3032_v6 }
  0xf8   :  { %2654 = vmatprep.mubr.msk.bf16.mxu1 %vm2987_vm0, %v2986_v1 }
 0x1ba   :  { %v239_v25 = vpop.f32.mrb[4].mxu1 }
 0x1bb   :  { %v240_v26 = vadd.f32 %v239_v25, %v3062_v24  ;;  %v2614_v27 = vpop.f32.mrb[5].mxu1  ;;  %v2897_v25 = vld [vmem:[%s3445_s1 + $0x28] sm:$0xff]  }
 0x1bc   :  { %v242_v28 = vpop.f32.mrb[6].mxu1 }
 0x1bd   :  { %v2615_v29 = vpop.f32.mrb[7].mxu1  ;;  %v246_v30 = vsel %vm245_vm4, %v240_v26, -inf }
 0x1be   :  { %247 = vmax.xlane.f32.xlu0 %v246_v30  ;;  %v2894_v29 = vld [vmem:[%s3445_s1 + $0x60] sm:$0xff]  }
 0x1c2   :  { %v358_v50 = vpop.f32.mrb[8].mxu1 }
 0x1c3   :  { %v2628_v51 = vpop.f32.mrb[9].mxu1  ;;  %v478_v63 = vmul.f32 0.25, %v358_v50 }
 0x1c4   :  { %v361_v52 = vpop.f32.mrb[10].mxu1 }
 0x1c5   :  { %v2629_v53 = vpop.f32.mrb[11].mxu1  ;;  %v479_v2 = vpack.c.bf16 %v478_v63, %v478_v63 }
 0x1ca   :  { %v472_v17 = vpop.f32.mrb[12].mxu1 }
 0x1cb   :  { %v2644_v18 = vpop.f32.mrb[13].mxu1  ;;  %v539_v21 = vpack.c.bf16 %v472_v17, %v472_v17 }
 0x1cc   :  { %v475_v19 = vpop.f32.mrb[14].mxu1 }
 0x1cd   :  { %v2645_v20 = vpop.f32.mrb[15].mxu1  ;;  %v544_v22 = vsel %vm262_vm5, %v539_v21, 0 }
 0x1ce   :  { %2653 = vmatpush3.bf16.msra.mxu1 %v544_v22 }
 0x1cf   :  { %2666 = vmatprep.subr.bf16.mxu1 %v2986_v1 }
 0x24b   :  { %v248_v31 = vpop.xlane.xlu0 %247 }
 0x24c   :  { %v249_v32 = vsub.f32 %v240_v26, %v248_v31  ;;  %v2896_v31 = vld [vmem:[%s3445_s1 + $0x68] sm:$0xff]  }
 0x24e   :  { %v250_v33 = vmul.f32 1.442695, %v249_v32 }
 0x250   :  { %2930 = vpow2.f32 %v250_v33 }
 0x25a   :  { %v2931_v34 = vpop.eup %2930 }
 0x25b   :  { %v252_v35 = vsel %vm245_vm4, %v2931_v34, 0.0 }
 0x25c   :  { %253 = vadd.xlane.f32.xlu0 %v252_v35 }
 0x2e9   :  { %v254_v44 = vpop.xlane.xlu0 %253 }
 0x2ea   :  { %2932 = vrcp.f32 %v254_v44 }
 0x2f4   :  { %v2933_v45 = vpop.eup %2932 }
 0x2f5   :  { %v256_v46 = vmul.f32 %v2933_v45, %v2931_v34 }
 0x2f7   :  { %v257_v48 = vpack.c.bf16 %v256_v46, %v256_v46 }
 0x2f9   :  { %2619 = vmatmul.mubr.msk.bf16.vlgmr.msra.gmra.mrb[8].mxu0 %vm245_vm4, %v257_v48  ;;  %v2898_v48 = vld [vmem:[%s3445_s1 + $0xa0] sm:$0xff]  }
 0x2fa   :  { %2631 = vmatpush3.bf16.msra.mxu0 %v2888_v47  ;;  %2634 = vmatprep.mubr.msk.bf16.mxu0 %vm2987_vm0, %v2986_v1 }
 0x2fb   :  { %2632 = vmatprep.subr.bf16.mxu0 %v2986_v1 }
 0x2fe   :  { %2633 = vmatpush3.bf16.msra.mxu0 %v2890_v49  ;;  %v2899_v49 = vld [vmem:[%s3445_s1 + $0xa8] sm:$0xff]  }
 0x2ff   :  { %2646 = vmatprep.subr.bf16.mxu0 %v2986_v1 }
 0x301   :  { %2635 = vmatmul.mubr.msk.bf16.vlgmr.msra.gmra.mrb[12].mxu0 %vm37_vm1, %v3032_v6 }
 0x302   :  { %2648 = vmatprep.mubr.msk.bf16.mxu0 %vm2987_vm0, %v2986_v1 }
 0x3cc   :  { %v300_v54 = vpop.f32.mrb[8].mxu0 }
 0x3cd   :  { %306 = vst.msk [vmem:[#allocation2] sm:$0xff] %vm198_vm2, %v300_v54  ;;  %v2620_v55 = vpop.f32.mrb[9].mxu0 }
 0x3ce   :  { %v303_v56 = vpop.f32.mrb[10].mxu0 }
 0x3cf   :  { %v2621_v57 = vpop.f32.mrb[11].mxu0 }
 0x3d4   :  { %v415_v58 = vpop.f32.mrb[12].mxu0 }
 0x3d5   :  { %v480_v59 = vpack.c.bf16 %v415_v58, %v415_v58  ;;  %v2636_v60 = vpop.f32.mrb[13].mxu0 }
 0x3d6   :  { %v418_v61 = vpop.f32.mrb[14].mxu0 }
 0x3d7   :  { %v485_v62 = vsel %vm198_vm2, %v480_v59, 0  ;;  %v2637_v0 = vpop.f32.mrb[15].mxu0 }
 0x3d8   :  { %2647 = vmatpush3.bf16.xpose.msra.mxu0 %v485_v62 }
 0x3d9   :  { %2658 = vmatprep.subr.bf16.mxu0 %v2986_v1 }
 0x3df   :  { %2649 = vmatmul.mubr.msk.bf16.vlgmr.msra.gmra.mrb[16].mxu0 %vm198_vm2, %v479_v2 }
 0x3e0   :  { %2662 = vmatprep.mubr.msk.bf16.mxu0 %vm2987_vm0, %v2986_v1  ;;  %2659 = vmatpush3.bf16.msra.mxu0 %v2895_v23 }
 0x3e1   :  { %2660 = vmatprep.subr.bf16.mxu0 %v2986_v1 }
 0x3e4   :  { %2661 = vmatpush3.bf16.msra.mxu0 %v2897_v25 }
 0x3e5   :  { %2674 = vmatprep.subr.bf16.mxu0 %v2986_v1 }
 0x3e7   :  { %2663 = vmatmul.mubr.msk.bf16.vlgmr.msra.gmra.mrb[20].mxu0 %vm37_vm1, %v3032_v6 }
 0x3e8   :  { %2678 = vmatprep.mubr.msk.bf16.mxu0 %vm2987_vm0, %v2986_v1  ;;  %2675 = vmatpush3.bf16.msra.mxu0 %v2898_v48 }
 0x3e9   :  { %2676 = vmatprep.subr.bf16.mxu0 %v2986_v1 }
 0x3ec   :  { %2677 = vmatpush3.bf16.msra.mxu0 %v2899_v49  ;;  %v2907_v49 = vld [vmem:[%s3445_s1] sm:$0xff]  }
 0x3ed   :  { %2688 = vmatprep.subr.bf16.mxu0 %v2986_v1 }
 0x3ef   :  { %2679 = vmatmul.mubr.msk.bf16.vlgmr.msra.gmra.mrb[24].mxu0 %vm37_vm1, %v3032_v6 }
 0x3f0   :  { %2690 = vmatprep.mubr.msk.bf16.mxu0 %vm2987_vm0, %v2986_v1 }
 0x4b2   :  { %v521_v5 = vpop.f32.mrb[16].mxu0 }
 0x4b3   :  { %v522_v7 = vadd.f32 %v521_v5, %v3062_v24  ;;  %v2650_v8 = vpop.f32.mrb[17].mxu0  ;;  %v2903_v5 = vld [vmem:[%s3445_s1 + $0x38] sm:$0xff]  }
 0x4b4   :  { %v524_v9 = vpop.f32.mrb[18].mxu0 }
 0x4b5   :  { %v2651_v10 = vpop.f32.mrb[19].mxu0  ;;  %v527_v11 = vsel %vm245_vm4, %v522_v7, -inf }
 0x4b6   :  { %528 = vmax.xlane.f32.xlu1 %v527_v11  ;;  %v2900_v10 = vld [vmem:[%s3445_s1 + $0x70] sm:$0xff]  }
 0x4ba   :  { %v643_v32 = vpop.f32.mrb[20].mxu0 }
 0x4bb   :  { %v2664_v33 = vpop.f32.mrb[21].mxu0  ;;  %v763_v45 = vmul.f32 0.25, %v643_v32 }
 0x4bc   :  { %v646_v34 = vpop.f32.mrb[22].mxu0 }
 0x4bd   :  { %v2665_v35 = vpop.f32.mrb[23].mxu0  ;;  %v764_v47 = vpack.c.bf16 %v763_v45, %v763_v45 }
 0x4c2   :  { %v757_v61 = vpop.f32.mrb[24].mxu0 }
 0x4c3   :  { %v2680_v62 = vpop.f32.mrb[25].mxu0  ;;  %v824_v2 = vpack.c.bf16 %v757_v61, %v757_v61 }
 0x4c4   :  { %v760_v63 = vpop.f32.mrb[26].mxu0 }
 0x4c5   :  { %v2681_v0 = vpop.f32.mrb[27].mxu0  ;;  %v829_v3 = vsel %vm262_vm5, %v824_v2, 0 }
 0x4c6   :  { %2689 = vmatpush3.bf16.msra.mxu0 %v829_v3 }
 0x4c7   :  { %2702 = vmatprep.subr.bf16.mxu0 %v2986_v1 }
 0x543   :  { %v529_v12 = vpop.xlane.xlu1 %528 }
 0x544   :  { %v530_v13 = vsub.f32 %v522_v7, %v529_v12  ;;  %v2902_v12 = vld [vmem:[%s3445_s1 + $0x78] sm:$0xff]  }
 0x546   :  { %v531_v14 = vmul.f32 1.442695, %v530_v13 }
 0x548   :  { %2934 = vpow2.f32 %v531_v14 }
 0x552   :  { %v2935_v15 = vpop.eup %2934 }
 0x553   :  { %v533_v16 = vsel %vm245_vm4, %v2935_v15, 0.0 }
 0x554   :  { %534 = vadd.xlane.f32.xlu1 %v533_v16 }
 0x5e1   :  { %v535_v26 = vpop.xlane.xlu1 %534 }
 0x5e2   :  { %2936 = vrcp.f32 %v535_v26 }
 0x5ec   :  { %v2937_v27 = vpop.eup %2936 }
 0x5ed   :  { %v537_v28 = vmul.f32 %v2937_v27, %v2935_v15 }
 0x5ef   :  { %v538_v30 = vpack.c.bf16 %v537_v28, %v537_v28 }
 0x5f1   :  { %2655 = vmatmul.mubr.msk.bf16.vlgmr.msra.gmra.mrb[16].mxu1 %vm245_vm4, %v538_v30  ;;  %v2904_v30 = vld [vmem:[%s3445_s1 + $0xb0] sm:$0xff]  }
 0x5f2   :  { %2667 = vmatpush3.bf16.msra.mxu1 %v2894_v29  ;;  %2670 = vmatprep.mubr.msk.bf16.mxu1 %vm2987_vm0, %v2986_v1 }
 0x5f3   :  { %2668 = vmatprep.subr.bf16.mxu1 %v2986_v1 }
 0x5f6   :  { %2669 = vmatpush3.bf16.msra.mxu1 %v2896_v31  ;;  %v2905_v31 = vld [vmem:[%s3445_s1 + $0xb8] sm:$0xff]  }
 0x5f7   :  { %2682 = vmatprep.subr.bf16.mxu1 %v2986_v1 }
 0x5f9   :  { %2671 = vmatmul.mubr.msk.bf16.vlgmr.msra.gmra.mrb[20].mxu1 %vm37_vm1, %v3032_v6 }
 0x5fa   :  { %2684 = vmatprep.mubr.msk.bf16.mxu1 %vm2987_vm0, %v2986_v1 }
 0x6c4   :  { %v3146_v36 = vpop.f32.mrb[16].mxu1 }
 0x6c5   :  { %v2656_v37 = vpop.f32.mrb[17].mxu1 }
 0x6c6   :  { %v583_v38 = vpop.f32.mrb[18].mxu1 }
 0x6c7   :  { %v2657_v39 = vpop.f32.mrb[19].mxu1 }
 0x6cc   :  { %v700_v40 = vpop.f32.mrb[20].mxu1 }
 0x6cd   :  { %v765_v41 = vpack.c.bf16 %v700_v40, %v700_v40  ;;  %v2672_v42 = vpop.f32.mrb[21].mxu1 }
 0x6ce   :  { %v703_v43 = vpop.f32.mrb[22].mxu1 }
 0x6cf   :  { %v770_v44 = vsel %vm198_vm2, %v765_v41, 0  ;;  %v2673_v46 = vpop.f32.mrb[23].mxu1 }
 0x6d0   :  { %2683 = vmatpush3.bf16.xpose.msra.mxu1 %v770_v44 }
 0x6d1   :  { %2694 = vmatprep.subr.bf16.mxu1 %v2986_v1 }
 0x6d7   :  { %2685 = vmatmul.mubr.msk.bf16.vlgmr.msra.gmra.mrb[24].mxu1 %vm198_vm2, %v764_v47 }
 0x6d8   :  { %2698 = vmatprep.mubr.msk.bf16.mxu1 %vm2987_vm0, %v2986_v1  ;;  %2695 = vmatpush3.bf16.msra.mxu1 %v2901_v4 }
 0x6d9   :  { %2696 = vmatprep.subr.bf16.mxu1 %v2986_v1 }
 0x6dc   :  { %2697 = vmatpush3.bf16.msra.mxu1 %v2903_v5 }
 0x6dd   :  { %2710 = vmatprep.subr.bf16.mxu1 %v2986_v1 }
 0x6df   :  { %2699 = vmatmul.mubr.msk.bf16.vlgmr.msra.gmra.mrb[28].mxu1 %vm37_vm1, %v3032_v6 }
 0x6e0   :  { %2714 = vmatprep.mubr.msk.bf16.mxu1 %vm2987_vm0, %v2986_v1  ;;  %2711 = vmatpush3.bf16.msra.mxu1 %v2904_v30 }
 0x6e1   :  { %2712 = vmatprep.subr.bf16.mxu1 %v2986_v1 }
 0x6e4   :  { %2713 = vmatpush3.bf16.msra.mxu1 %v2905_v31 }
 0x6e5   :  { %2724 = vmatprep.subr.bf16.mxu1 %v2986_v1 }
 0x6e7   :  { %2715 = vmatmul.mubr.msk.bf16.vlgmr.msra.gmra.mrb[32].mxu1 %vm37_vm1, %v3032_v6 }
 0x6e8   :  { %2726 = vmatprep.mubr.msk.bf16.mxu1 %vm2987_vm0, %v2986_v1 }
 0x7aa   :  { %v806_v50 = vpop.f32.mrb[24].mxu1 }
 0x7ab   :  { %v807_v51 = vadd.f32 %v806_v50, %v3062_v24  ;;  %v2686_v52 = vpop.f32.mrb[25].mxu1  ;;  %v2909_v50 = vld [vmem:[%s3445_s1 + $0x8] sm:$0xff]  }
 0x7ac   :  { %v809_v53 = vpop.f32.mrb[26].mxu1 }
 0x7ad   :  { %v2687_v54 = vpop.f32.mrb[27].mxu1  ;;  %v812_v55 = vsel %vm245_vm4, %v807_v51, -inf }
 0x7ae   :  { %813 = vmax.xlane.f32.xlu0 %v812_v55 }
 0x7b2   :  { %v928_v13 = vpop.f32.mrb[28].mxu1 }
 0x7b3   :  { %v2700_v14 = vpop.f32.mrb[29].mxu1  ;;  %v1048_v27 = vmul.f32 0.25, %v928_v13  ;;  %v2910_v13 = vld [vmem:[%s3445_s1 + $0x80] sm:$0xff]  }
 0x7b4   :  { %v931_v15 = vpop.f32.mrb[30].mxu1  ;;  %v2911_v14 = vld [vmem:[%s3445_s1 + $0x88] sm:$0xff]  }
 0x7b5   :  { %v2701_v16 = vpop.f32.mrb[31].mxu1  ;;  %v1049_v29 = vpack.c.bf16 %v1048_v27, %v1048_v27 }
 0x83b   :  { %v814_v56 = vpop.xlane.xlu0 %813 }
 0x83c   :  { %v815_v57 = vsub.f32 %v807_v51, %v814_v56  ;;  %v2393_v51 = vld [vmem:[%s3444_s0 + $0x8] sm:$0xff]  ;;  %v2906_v56 = vld [vmem:[%s3445_s1 + $0x40] sm:$0xff]  }
 0x83d   :  { %v3231_v52 = vpack.c.bf16 %v2393_v51, %v2393_v51 }
 0x83e   :  { %v816_v58 = vmul.f32 1.442695, %v815_v57 }
 0x840   :  { %2938 = vpow2.f32 %v816_v58  ;;  %v2908_v58 = vld [vmem:[%s3445_s1 + $0x48] sm:$0xff]  }
 0x84a   :  { %v2939_v59 = vpop.eup %2938 }
 0x84b   :  { %v818_v60 = vsel %vm245_vm4, %v2939_v59, 0.0 }
 0x84c   :  { %819 = vadd.xlane.f32.xlu1 %v818_v60 }
 0x8d9   :  { %v820_v7 = vpop.xlane.xlu1 %819 }
 0x8da   :  { %2940 = vrcp.f32 %v820_v7 }
 0x8e4   :  { %v2941_v8 = vpop.eup %2940 }
 0x8e5   :  { %v822_v9 = vmul.f32 %v2941_v8, %v2939_v59 }
 0x8e7   :  { %v823_v11 = vpack.c.bf16 %v822_v9, %v822_v9 }
 0x8e9   :  { %2691 = vmatmul.mubr.msk.bf16.vlgmr.msra.gmra.mrb[28].mxu0 %vm245_vm4, %v823_v11 }
 0x8ea   :  { %2703 = vmatpush3.bf16.msra.mxu0 %v2900_v10  ;;  %2706 = vmatprep.mubr.msk.bf16.mxu0 %vm2987_vm0, %v2986_v1 }
 0x8eb   :  { %2704 = vmatprep.subr.bf16.mxu0 %v2986_v1 }
 0x8ee   :  { %2705 = vmatpush3.bf16.msra.mxu0 %v2902_v12 }
 0x8ef   :  { %2718 = vmatprep.subr.bf16.mxu0 %v2986_v1 }
 0x8f1   :  { %2707 = vmatmul.mubr.msk.bf16.vlgmr.msra.gmra.mrb[32].mxu0 %vm37_vm1, %v3032_v6  ;;  %v1042_v6 = vpop.f32.mrb[32].mxu1 }
 0x8f2   :  { %2720 = vmatprep.mubr.msk.bf16.mxu0 %vm2987_vm0, %v2986_v1  ;;  %v2716_v44 = vpop.f32.mrb[33].mxu1  ;;  %v1109_v47 = vpack.c.bf16 %v1042_v6, %v1042_v6 }
 0x8f3   :  { %v1045_v45 = vpop.f32.mrb[34].mxu1 }
 0x8f4   :  { %v2717_v46 = vpop.f32.mrb[35].mxu1  ;;  %v1114_v48 = vsel %vm262_vm5, %v1109_v47, 0 }
 0x8f5   :  { %2725 = vmatpush3.bf16.msra.mxu1 %v1114_v48 }
 0x8f6   :  { %2738 = vmatprep.subr.bf16.mxu1 %v2986_v1 }
 0x9bc   :  { %v3197_v17 = vpop.f32.mrb[28].mxu0 }
 0x9bd   :  { %v2692_v18 = vpop.f32.mrb[29].mxu0 }
 0x9be   :  { %v868_v19 = vpop.f32.mrb[30].mxu0 }
 0x9bf   :  { %v2693_v20 = vpop.f32.mrb[31].mxu0 }
 0x9c4   :  { %v985_v21 = vpop.f32.mrb[32].mxu0 }
 0x9c5   :  { %v1050_v22 = vpack.c.bf16 %v985_v21, %v985_v21  ;;  %v2708_v23 = vpop.f32.mrb[33].mxu0 }
 0x9c6   :  { %v988_v25 = vpop.f32.mrb[34].mxu0 }
 0x9c7   :  { %v1055_v26 = vsel %vm198_vm2, %v1050_v22, 0  ;;  %v2709_v28 = vpop.f32.mrb[35].mxu0 }
 0x9c8   :  { %2719 = vmatpush3.bf16.xpose.msra.mxu0 %v1055_v26 }
 0x9c9   :  { %2730 = vmatprep.subr.bf16.mxu0 %v2986_v1 }
 0x9cf   :  { %2721 = vmatmul.mubr.msk.bf16.vlgmr.msra.gmra.mrb[36].mxu0 %vm198_vm2, %v1049_v29 }
 0x9d0   :  { %2734 = vmatprep.mubr.msk.bf16.mxu0 %vm2987_vm0, %v2986_v1  ;;  %2731 = vmatpush3.bf16.msra.mxu0 %v2907_v49 }
 0x9d1   :  { %2732 = vmatprep.subr.bf16.mxu0 %v2986_v1 }
 0x9d4   :  { %2733 = vmatpush3.bf16.msra.mxu0 %v2909_v50 }
 0x9d5   :  { %2746 = vmatprep.subr.bf16.mxu0 %v2986_v1 }
 0x9d7   :  { %2735 = vmatmul.mubr.msk.bf16.vlgmr.msra.gmra.mrb[40].mxu0 %vm37_vm1, %v3231_v52 }
 0x9d8   :  { %2750 = vmatprep.mubr.msk.bf16.mxu0 %vm2987_vm0, %v2986_v1  ;;  %2747 = vmatpush3.bf16.msra.mxu0 %v2910_v13 }
 0x9d9   :  { %2748 = vmatprep.subr.bf16.mxu0 %v2986_v1 }
 0x9dc   :  { %2749 = vmatpush3.bf16.msra.mxu0 %v2911_v14 }
 0x9dd   :  { %2760 = vmatprep.subr.bf16.mxu0 %v2986_v1 }
 0x9df   :  { %2751 = vmatmul.mubr.msk.bf16.vlgmr.msra.gmra.mrb[44].mxu0 %vm37_vm1, %v3231_v52 }
 0x9e0   :  { %2762 = vmatprep.mubr.msk.bf16.mxu0 %vm2987_vm0, %v2986_v1 }
 0xaa2   :  { %v1091_v32 = vpop.f32.mrb[36].mxu0 }
 0xaa3   :  { %v1092_v33 = vadd.f32 %v1091_v32, %v3062_v24  ;;  %v2722_v34 = vpop.f32.mrb[37].mxu0 }
 0xaa4   :  { %v1094_v35 = vpop.f32.mrb[38].mxu0  ;;  %v2913_v34 = vld [vmem:[%s3445_s1 + $0x10] sm:$0xff]  }
 0xaa5   :  { %v2723_v37 = vpop.f32.mrb[39].mxu0  ;;  %v1097_v38 = vsel %vm245_vm4, %v1092_v33, -inf  ;;  %v2915_v35 = vld [vmem:[%s3445_s1 + $0x18] sm:$0xff]  }
 0xaa6   :  { %1098 = vmax.xlane.f32.xlu0 %v1097_v38 }
 0xaaa   :  { %v1218_v59 = vpop.f32.mrb[40].mxu0 }
 0xaab   :  { %v2736_v60 = vpop.f32.mrb[41].mxu0  ;;  %v1336_v10 = vmul.f32 0.25, %v1218_v59  ;;  %v2916_v59 = vld [vmem:[%s3445_s1 + $0x90] sm:$0xff]  }
 0xaac   :  { %v1221_v61 = vpop.f32.mrb[42].mxu0  ;;  %v2917_v60 = vld [vmem:[%s3445_s1 + $0x98] sm:$0xff]  }
 0xaad   :  { %v2737_v62 = vpop.f32.mrb[43].mxu0  ;;  %v1337_v12 = vpack.c.bf16 %v1336_v10, %v1336_v10 }
 0xab2   :  { %v1330_v28 = vpop.f32.mrb[44].mxu0 }
 0xab3   :  { %v2752_v29 = vpop.f32.mrb[45].mxu0  ;;  %v1397_v32 = vpack.c.bf16 %v1330_v28, %v1330_v28 }
 0xab4   :  { %v1333_v30 = vpop.f32.mrb[46].mxu0 }
 0xab5   :  { %v2753_v31 = vpop.f32.mrb[47].mxu0 }
 0xb33   :  { %v1099_v39 = vpop.xlane.xlu0 %1098 }
 0xb34   :  { %v1100_v40 = vsub.f32 %v1092_v33, %v1099_v39  ;;  %v1402_v33 = vsel %vm262_vm5, %v1397_v32, 0 }
 0xb35   :  { %2761 = vmatpush3.bf16.msra.mxu0 %v1402_v33 }
 0xb36   :  { %v1101_v41 = vmul.f32 1.442695, %v1100_v40  ;;  %2774 = vmatprep.subr.bf16.mxu0 %v2986_v1  ;;  %v2912_v40 = vld [vmem:[%s3445_s1 + $0x50] sm:$0xff]  }
 0xb38   :  { %2942 = vpow2.f32 %v1101_v41 }
 0xb42   :  { %v2943_v42 = vpop.eup %2942 }
 0xb43   :  { %v1103_v43 = vsel %vm245_vm4, %v2943_v42, 0.0 }
 0xb44   :  { %1104 = vadd.xlane.f32.xlu1 %v1103_v43 }
 0xbd1   :  { %v1105_v53 = vpop.xlane.xlu1 %1104 }
 0xbd2   :  { %2944 = vrcp.f32 %v1105_v53 }
 0xbdc   :  { %v2945_v54 = vpop.eup %2944 }
 0xbdd   :  { %v1107_v55 = vmul.f32 %v2945_v54, %v2943_v42  ;;  %v2914_v42 = vld [vmem:[%s3445_s1 + $0x58] sm:$0xff]  }
 0xbdf   :  { %v1108_v57 = vpack.c.bf16 %v1107_v55, %v1107_v55 }
 0xbe1   :  { %2727 = vmatmul.mubr.msk.bf16.vlgmr.msra.gmra.mrb[36].mxu1 %vm245_vm4, %v1108_v57 }
 0xbe2   :  { %2739 = vmatpush3.bf16.msra.mxu1 %v2906_v56  ;;  %2742 = vmatprep.mubr.msk.bf16.mxu1 %vm2987_vm0, %v2986_v1 }
 0xbe3   :  { %2740 = vmatprep.subr.bf16.mxu1 %v2986_v1 }
 0xbe6   :  { %2741 = vmatpush3.bf16.msra.mxu1 %v2908_v58 }
 0xbe7   :  { %2754 = vmatprep.subr.bf16.mxu1 %v2986_v1 }
 0xbe9   :  { %2743 = vmatmul.mubr.msk.bf16.vlgmr.msra.gmra.mrb[40].mxu1 %vm37_vm1, %v3231_v52 }
 0xbea   :  { %2756 = vmatprep.mubr.msk.bf16.mxu1 %vm2987_vm0, %v2986_v1 }
 0xcb4   :  { %v3253_v63 = vpop.f32.mrb[36].mxu1 }
 0xcb5   :  { %v2728_v0 = vpop.f32.mrb[37].mxu1 }
 0xcb6   :  { %v1153_v2 = vpop.f32.mrb[38].mxu1 }
 0xcb7   :  { %v2729_v3 = vpop.f32.mrb[39].mxu1 }
 0xcbc   :  { %v1274_v4 = vpop.f32.mrb[40].mxu1 }
 0xcbd   :  { %v1338_v5 = vpack.c.bf16 %v1274_v4, %v1274_v4  ;;  %v2744_v7 = vpop.f32.mrb[41].mxu1 }
 0xcbe   :  { %v1277_v8 = vpop.f32.mrb[42].mxu1 }
 0xcbf   :  { %v1343_v9 = vsel %vm198_vm2, %v1338_v5, 0  ;;  %v2745_v11 = vpop.f32.mrb[43].mxu1 }
 0xcc0   :  { %2755 = vmatpush3.bf16.xpose.msra.mxu1 %v1343_v9 }
 0xcc1   :  { %2766 = vmatprep.subr.bf16.mxu1 %v2986_v1 }
 0xcc7   :  { %2757 = vmatmul.mubr.msk.bf16.vlgmr.msra.gmra.mrb[44].mxu1 %vm198_vm2, %v1337_v12 }
 0xcc8   :  { %2770 = vmatprep.mubr.msk.bf16.mxu1 %vm2987_vm0, %v2986_v1  ;;  %2767 = vmatpush3.bf16.msra.mxu1 %v2913_v34 }
 0xcc9   :  { %2768 = vmatprep.subr.bf16.mxu1 %v2986_v1 }
 0xccc   :  { %2769 = vmatpush3.bf16.msra.mxu1 %v2915_v35 }
 0xccd   :  { %2782 = vmatprep.subr.bf16.mxu1 %v2986_v1 }
 0xccf   :  { %2771 = vmatmul.mubr.msk.bf16.vlgmr.msra.gmra.mrb[48].mxu1 %vm37_vm1, %v3231_v52 }
 0xcd0   :  { %2786 = vmatprep.mubr.msk.bf16.mxu1 %vm2987_vm0, %v2986_v1  ;;  %2783 = vmatpush3.bf16.msra.mxu1 %v2916_v59 }
 0xcd1   :  { %2784 = vmatprep.subr.bf16.mxu1 %v2986_v1 }
 0xcd4   :  { %2785 = vmatpush3.bf16.msra.mxu1 %v2917_v60 }
 0xcd5   :  { %2796 = vmatprep.subr.bf16.mxu1 %v2986_v1 }
 0xcd7   :  { %2787 = vmatmul.mubr.msk.bf16.vlgmr.msra.gmra.mrb[52].mxu1 %vm37_vm1, %v3231_v52 }
 0xcd8   :  { %2798 = vmatprep.mubr.msk.bf16.mxu1 %vm2987_vm0, %v2986_v1 }
 0xd9a   :  { %v1379_v15 = vpop.f32.mrb[44].mxu1 }
 0xd9b   :  { %v1380_v16 = vadd.f32 %v1379_v15, %v3062_v24  ;;  %v2758_v18 = vpop.f32.mrb[45].mxu1 }
 0xd9c   :  { %v1382_v19 = vpop.f32.mrb[46].mxu1  ;;  %v2919_v18 = vld [vmem:[%s3445_s1 + $0x20] sm:$0xff]  }
 0xd9d   :  { %v2759_v20 = vpop.f32.mrb[47].mxu1  ;;  %v1385_v21 = vsel %vm245_vm4, %v1380_v16, -inf  ;;  %v2921_v19 = vld [vmem:[%s3445_s1 + $0x28] sm:$0xff]  }
 0xd9e   :  { %1386 = vmax.xlane.f32.xlu0 %v1385_v21 }
 0xda2   :  { %v1496_v43 = vpop.f32.mrb[48].mxu1 }
 0xda3   :  { %v2772_v6 = vpop.f32.mrb[49].mxu1  ;;  %v1614_v56 = vmul.f32 0.25, %v1496_v43 }
 0xda4   :  { %v1499_v44 = vpop.f32.mrb[50].mxu1  ;;  %v2922_v6 = vld [vmem:[%s3445_s1 + $0xa0] sm:$0xff]  }
 0xda5   :  { %v2773_v45 = vpop.f32.mrb[51].mxu1  ;;  %v1615_v58 = vpack.c.bf16 %v1614_v56, %v1614_v56  ;;  %v2923_v44 = vld [vmem:[%s3445_s1 + $0xa8] sm:$0xff]  }
 0xdaa   :  { %v1608_v11 = vpop.f32.mrb[52].mxu1 }
 0xdab   :  { %v2788_v12 = vpop.f32.mrb[53].mxu1  ;;  %v1675_v15 = vpack.c.bf16 %v1608_v11, %v1608_v11 }
 0xdac   :  { %v1611_v13 = vpop.f32.mrb[54].mxu1 }
 0xdad   :  { %v2789_v14 = vpop.f32.mrb[55].mxu1 }
 0xe2b   :  { %v1387_v22 = vpop.xlane.xlu0 %1386 }
 0xe2c   :  { %v1388_v23 = vsub.f32 %v1380_v16, %v1387_v22  ;;  %v1680_v16 = vsel %vm262_vm5, %v1675_v15, 0 }
 0xe2d   :  { %2797 = vmatpush3.bf16.msra.mxu1 %v1680_v16 }
 0xe2e   :  { %v1389_v25 = vmul.f32 1.442695, %v1388_v23  ;;  %2810 = vmatprep.subr.bf16.mxu1 %v2986_v1  ;;  %v2918_v23 = vld [vmem:[%s3445_s1 + $0x60] sm:$0xff]  }
 0xe30   :  { %2946 = vpow2.f32 %v1389_v25 }
 0xe3a   :  { %v2947_v26 = vpop.eup %2946 }
 0xe3b   :  { %v1391_v27 = vsel %vm245_vm4, %v2947_v26, 0.0 }
 0xe3c   :  { %1392 = vadd.xlane.f32.xlu1 %v1391_v27 }
 0xec9   :  { %v1393_v37 = vpop.xlane.xlu1 %1392 }
 0xeca   :  { %2948 = vrcp.f32 %v1393_v37 }
 0xed4   :  { %v2949_v38 = vpop.eup %2948 }
 0xed5   :  { %v1395_v39 = vmul.f32 %v2949_v38, %v2947_v26  ;;  %v2920_v26 = vld [vmem:[%s3445_s1 + $0x68] sm:$0xff]  }
 0xed7   :  { %v1396_v41 = vpack.c.bf16 %v1395_v39, %v1395_v39 }
 0xed9   :  { %2763 = vmatmul.mubr.msk.bf16.vlgmr.msra.gmra.mrb[48].mxu0 %vm245_vm4, %v1396_v41 }
 0xeda   :  { %2775 = vmatpush3.bf16.msra.mxu0 %v2912_v40  ;;  %2778 = vmatprep.mubr.msk.bf16.mxu0 %vm2987_vm0, %v2986_v1 }
 0xedb   :  { %2776 = vmatprep.subr.bf16.mxu0 %v2986_v1 }
 0xede   :  { %2777 = vmatpush3.bf16.msra.mxu0 %v2914_v42 }
 0xedf   :  { %2790 = vmatprep.subr.bf16.mxu0 %v2986_v1 }
 0xee1   :  { %2779 = vmatmul.mubr.msk.bf16.vlgmr.msra.gmra.mrb[52].mxu0 %vm37_vm1, %v3231_v52 }
 0xee2   :  { %2792 = vmatprep.mubr.msk.bf16.mxu0 %vm2987_vm0, %v2986_v1 }
 0xfac   :  { %v1438_v46 = vpop.f32.mrb[48].mxu0 }
 0xfad   :  { %1445 = vst.msk [vmem:[#allocation2 + $0x8] sm:$0xff] %vm198_vm2, %v1438_v46  ;;  %v2764_v47 = vpop.f32.mrb[49].mxu0 }
 0xfae   :  { %v1441_v48 = vpop.f32.mrb[50].mxu0 }
 0xfaf   :  { %v2765_v49 = vpop.f32.mrb[51].mxu0 }
 0xfb4   :  { %v1552_v50 = vpop.f32.mrb[52].mxu0 }
 0xfb5   :  { %v1616_v51 = vpack.c.bf16 %v1552_v50, %v1552_v50  ;;  %v2780_v53 = vpop.f32.mrb[53].mxu0 }
 0xfb6   :  { %v1555_v54 = vpop.f32.mrb[54].mxu0 }
 0xfb7   :  { %v1621_v55 = vsel %vm198_vm2, %v1616_v51, 0  ;;  %v2781_v57 = vpop.f32.mrb[55].mxu0 }
 0xfb8   :  { %2791 = vmatpush3.bf16.xpose.msra.mxu0 %v1621_v55 }
 0xfb9   :  { %2802 = vmatprep.subr.bf16.mxu0 %v2986_v1 }
 0xfbf   :  { %2793 = vmatmul.mubr.msk.bf16.vlgmr.msra.gmra.mrb[56].mxu0 %vm198_vm2, %v1615_v58 }
 0xfc0   :  { %2806 = vmatprep.mubr.msk.bf16.mxu0 %vm2987_vm0, %v2986_v1  ;;  %2803 = vmatpush3.bf16.msra.mxu0 %v2919_v18 }
 0xfc1   :  { %2804 = vmatprep.subr.bf16.mxu0 %v2986_v1 }
 0xfc4   :  { %2805 = vmatpush3.bf16.msra.mxu0 %v2921_v19 }
 0xfc5   :  { %2818 = vmatprep.subr.bf16.mxu0 %v2986_v1 }
 0xfc7   :  { %2807 = vmatmul.mubr.msk.bf16.vlgmr.msra.gmra.mrb[60].mxu0 %vm37_vm1, %v3231_v52 }
 0xfc8   :  { %2822 = vmatprep.mubr.msk.bf16.mxu0 %vm2987_vm0, %v2986_v1  ;;  %2819 = vmatpush3.bf16.msra.mxu0 %v2922_v6 }
 0xfc9   :  { %2820 = vmatprep.subr.bf16.mxu0 %v2986_v1 }
 0xfcc   :  { %2821 = vmatpush3.bf16.msra.mxu0 %v2923_v44 }
 0xfcd   :  { %2832 = vmatprep.subr.bf16.mxu0 %v2986_v1 }
 0xfcf   :  { %2823 = vmatmul.mubr.msk.bf16.vlgmr.msra.gmra.mrb[64].mxu0 %vm37_vm1, %v3231_v52 }
 0xfd0   :  { %2834 = vmatprep.mubr.msk.bf16.mxu0 %vm2987_vm0, %v2986_v1 }
0x1092   :  { %v1657_v61 = vpop.f32.mrb[56].mxu0 }
0x1093   :  { %v1658_v62 = vadd.f32 %v1657_v61, %v3062_v24  ;;  %v2794_v0 = vpop.f32.mrb[57].mxu0 }
0x1094   :  { %v1660_v2 = vpop.f32.mrb[58].mxu0  ;;  %v2925_v0 = vld [vmem:[%s3445_s1 + $0x30] sm:$0xff]  }
0x1095   :  { %v2795_v3 = vpop.f32.mrb[59].mxu0  ;;  %v1663_v4 = vsel %vm245_vm4, %v1658_v62, -inf  ;;  %v2927_v2 = vld [vmem:[%s3445_s1 + $0x38] sm:$0xff]  }
0x1096   :  { %1664 = vmax.xlane.f32.xlu0 %v1663_v4 }
0x109a   :  { %v1777_v27 = vpop.f32.mrb[60].mxu0 }
0x109b   :  { %v2808_v28 = vpop.f32.mrb[61].mxu0  ;;  %v1895_v41 = vmul.f32 0.25, %v1777_v27 }
0x109c   :  { %v1780_v29 = vpop.f32.mrb[62].mxu0  ;;  %v2928_v28 = vld [vmem:[%s3445_s1 + $0xb0] sm:$0xff]  }
0x109d   :  { %v2809_v30 = vpop.f32.mrb[63].mxu0  ;;  %v1896_v43 = vpack.c.bf16 %v1895_v41, %v1895_v41  ;;  %v2929_v29 = vld [vmem:[%s3445_s1 + $0xb8] sm:$0xff]  }
0x10a2   :  { %v1889_v57 = vpop.f32.mrb[64].mxu0 }
0x10a3   :  { %v2824_v58 = vpop.f32.mrb[65].mxu0  ;;  %v1956_v61 = vpack.c.bf16 %v1889_v57, %v1889_v57 }
0x10a4   :  { %v1892_v59 = vpop.f32.mrb[66].mxu0 }
0x10a5   :  { %v2825_v60 = vpop.f32.mrb[67].mxu0 }
0x1123   :  { %v1665_v5 = vpop.xlane.xlu0 %1664 }
0x1124   :  { %v1666_v7 = vsub.f32 %v1658_v62, %v1665_v5  ;;  %v1961_v62 = vsel %vm262_vm5, %v1956_v61, 0 }
0x1125   :  { %2833 = vmatpush3.bf16.msra.mxu0 %v1961_v62 }
0x1126   :  { %v1667_v8 = vmul.f32 1.442695, %v1666_v7  ;;  %2846 = vmatprep.subr.bf16.mxu0 %v2986_v1  ;;  %v2924_v7 = vld [vmem:[%s3445_s1 + $0x70] sm:$0xff]  }
0x1128   :  { %2950 = vpow2.f32 %v1667_v8 }
0x1132   :  { %v2951_v9 = vpop.eup %2950 }
0x1133   :  { %v1669_v10 = vsel %vm245_vm4, %v2951_v9, 0.0 }
0x1134   :  { %1670 = vadd.xlane.f32.xlu1 %v1669_v10 }
0x11c1   :  { %v1671_v20 = vpop.xlane.xlu1 %1670 }
0x11c2   :  { %2952 = vrcp.f32 %v1671_v20 }
0x11cc   :  { %v2953_v21 = vpop.eup %2952 }
0x11cd   :  { %v1673_v22 = vmul.f32 %v2953_v21, %v2951_v9  ;;  %v2926_v9 = vld [vmem:[%s3445_s1 + $0x78] sm:$0xff]   ;;  %s2988_s1 = smov 16  }
0x11cf   :  { %v1674_v25 = vpack.c.bf16 %v1673_v22, %v1673_v22 }
0x11d1   :  { %2799 = vmatmul.mubr.msk.bf16.vlgmr.msra.gmra.mrb[56].mxu1 %vm245_vm4, %v1674_v25 }
0x11d2   :  { %2811 = vmatpush3.bf16.msra.mxu1 %v2918_v23  ;;  %2814 = vmatprep.mubr.msk.bf16.mxu1 %vm2987_vm0, %v2986_v1 }
0x11d3   :  { %2812 = vmatprep.subr.bf16.mxu1 %v2986_v1 }
0x11d6   :  { %2813 = vmatpush3.bf16.msra.mxu1 %v2920_v26 }
0x11d7   :  { %2826 = vmatprep.subr.bf16.mxu1 %v2986_v1 }
0x11d9   :  { %2815 = vmatmul.mubr.msk.bf16.vlgmr.msra.gmra.mrb[60].mxu1 %vm37_vm1, %v3231_v52 }
0x11da   :  { %2828 = vmatprep.mubr.msk.bf16.mxu1 %vm2987_vm0, %v2986_v1 }
0x12a4   :  { %v3354_v31 = vpop.f32.mrb[56].mxu1 }
0x12a5   :  { %v2800_v32 = vpop.f32.mrb[57].mxu1 }
0x12a6   :  { %v1719_v33 = vpop.f32.mrb[58].mxu1 }
0x12a7   :  { %v2801_v34 = vpop.f32.mrb[59].mxu1 }
0x12ac   :  { %v1833_v35 = vpop.f32.mrb[60].mxu1 }
0x12ad   :  { %v1897_v37 = vpack.c.bf16 %v1833_v35, %v1833_v35  ;;  %v2816_v38 = vpop.f32.mrb[61].mxu1 }
0x12ae   :  { %v1836_v39 = vpop.f32.mrb[62].mxu1 }
0x12af   :  { %v1902_v40 = vsel %vm198_vm2, %v1897_v37, 0  ;;  %v2817_v42 = vpop.f32.mrb[63].mxu1 }
0x12b0   :  { %2827 = vmatpush3.bf16.xpose.msra.mxu1 %v1902_v40 }
0x12b1   :  { %2838 = vmatprep.subr.bf16.mxu1 %v2986_v1 }
0x12b7   :  { %2829 = vmatmul.mubr.msk.bf16.vlgmr.msra.gmra.mrb[64].mxu1 %vm198_vm2, %v1896_v43 }
0x12b8   :  { %2842 = vmatprep.mubr.msk.bf16.mxu1 %vm2987_vm0, %v2986_v1  ;;  %2839 = vmatpush3.bf16.msra.mxu1 %v2925_v0 }
0x12b9   :  { %2840 = vmatprep.subr.bf16.mxu1 %v2986_v1 }
0x12bc   :  { %2841 = vmatpush3.bf16.msra.mxu1 %v2927_v2 }
0x12bd   :  { %2854 = vmatprep.subr.bf16.mxu1 %v2986_v1 }
0x12bf   :  { %2843 = vmatmul.mubr.msk.bf16.vlgmr.msra.gmra.mrb[68].mxu1 %vm37_vm1, %v3231_v52 }
0x12c0   :  { %2858 = vmatprep.mubr.msk.bf16.mxu1 %vm2987_vm0, %v2986_v1  ;;  %2855 = vmatpush3.bf16.msra.mxu1 %v2928_v28 }
0x12c1   :  { %2856 = vmatprep.subr.bf16.mxu1 %v2986_v1 }
0x12c4   :  { %2857 = vmatpush3.bf16.msra.mxu1 %v2929_v29 }
0x12c5   :  { %2868 = vmatprep.subr.bf16.mxu1 %v2986_v1 }
0x12c7   :  { %2859 = vmatmul.mubr.msk.bf16.vlgmr.msra.gmra.mrb[72].mxu1 %vm37_vm1, %v3231_v52 }
0x12c8   :  { %2870 = vmatprep.mubr.msk.bf16.mxu1 %vm2987_vm0, %v2986_v1 }
0x138a   :  { %v1938_v45 = vpop.f32.mrb[64].mxu1 }
0x138b   :  { %v1939_v46 = vadd.f32 %v1938_v45, %v3062_v24  ;;  %v2830_v47 = vpop.f32.mrb[65].mxu1 }
0x138c   :  { %v1941_v48 = vpop.f32.mrb[66].mxu1 }
0x138d   :  { %v2831_v49 = vpop.f32.mrb[67].mxu1  ;;  %v1944_v50 = vsel %vm245_vm4, %v1939_v46, -inf }
0x138e   :  { %1945 = vmax.xlane.f32.xlu0 %v1944_v50 }
0x1392   :  { %v2058_v10 = vpop.f32.mrb[68].mxu1 }
0x1393   :  { %v2844_v11 = vpop.f32.mrb[69].mxu1  ;;  %v2176_v26 = vmul.f32 0.25, %v2058_v10 }
0x1394   :  { %v2061_v12 = vpop.f32.mrb[70].mxu1 }
0x1395   :  { %v2845_v13 = vpop.f32.mrb[71].mxu1  ;;  %v2177_v27 = vpack.c.bf16 %v2176_v26, %v2176_v26 }
0x139a   :  { %v2170_v41 = vpop.f32.mrb[72].mxu1 }
0x139b   :  { %v2860_v42 = vpop.f32.mrb[73].mxu1  ;;  %v2237_v6 = vpack.c.bf16 %v2170_v41, %v2170_v41 }
0x139d   :  { %v2242_v44 = vsel %vm262_vm5, %v2237_v6, 0 }
0x139e   :  { %2869 = vmatpush3.bf16.msra.mxu1 %v2242_v44 }
0x141b   :  { %v1946_v51 = vpop.xlane.xlu0 %1945 }
0x141c   :  { %v1947_v53 = vsub.f32 %v1939_v46, %v1946_v51 }
0x141e   :  { %v1948_v54 = vmul.f32 1.442695, %v1947_v53 }
0x1420   :  { %2954 = vpow2.f32 %v1948_v54 }
0x142a   :  { %v2955_v55 = vpop.eup %2954 }
0x142b   :  { %v1950_v56 = vsel %vm245_vm4, %v2955_v55, 0.0 }
0x142c   :  { %1951 = vadd.xlane.f32.xlu1 %v1950_v56 }
0x14b9   :  { %v1952_v3 = vpop.xlane.xlu1 %1951 }
0x14ba   :  { %2956 = vrcp.f32 %v1952_v3 }
0x14c4   :  { %v2957_v4 = vpop.eup %2956 }
0x14c5   :  { %v1954_v5 = vmul.f32 %v2957_v4, %v2955_v55 }
0x14c7   :  { %v1955_v8 = vpack.c.bf16 %v1954_v5, %v1954_v5 }
0x14c9   :  { %2835 = vmatmul.mubr.msk.bf16.vlgmr.msra.gmra.mrb[68].mxu0 %vm245_vm4, %v1955_v8 }
0x14ca   :  { %2847 = vmatpush3.bf16.msra.mxu0 %v2924_v7  ;;  %2850 = vmatprep.mubr.msk.bf16.mxu0 %vm2987_vm0, %v2986_v1 }
0x14cb   :  { %2848 = vmatprep.subr.bf16.mxu0 %v2986_v1 }
0x14ce   :  { %2849 = vmatpush3.bf16.msra.mxu0 %v2926_v9 }
0x14cf   :  { %2862 = vmatprep.subr.bf16.mxu0 %v2986_v1 }
0x14d1   :  { %2851 = vmatmul.mubr.msk.bf16.vlgmr.msra.gmra.mrb[72].mxu0 %vm37_vm1, %v3231_v52 }
0x14d2   :  { %2864 = vmatprep.mubr.msk.bf16.mxu0 %vm2987_vm0, %v2986_v1 }
0x159c   :  { %v1997_v14 = vpop.f32.mrb[68].mxu0 }
0x159d   :  { %v2836_v15 = vpop.f32.mrb[69].mxu0 }
0x159e   :  { %v2000_v16 = vpop.f32.mrb[70].mxu0 }
0x159f   :  { %v2837_v18 = vpop.f32.mrb[71].mxu0 }
0x15a4   :  { %v2114_v19 = vpop.f32.mrb[72].mxu0 }
0x15a5   :  { %v2178_v20 = vpack.c.bf16 %v2114_v19, %v2114_v19  ;;  %v2852_v21 = vpop.f32.mrb[73].mxu0 }
0x15a6   :  { %v2117_v22 = vpop.f32.mrb[74].mxu0 }
0x15a7   :  { %v2183_v23 = vsel %vm198_vm2, %v2178_v20, 0  ;;  %v2853_v25 = vpop.f32.mrb[75].mxu0 }
0x15a8   :  { %2863 = vmatpush3.bf16.xpose.msra.mxu0 %v2183_v23 }
0x15af   :  { %2865 = vmatmul.mubr.msk.bf16.vlgmr.msra.gmra.mrb[76].mxu0 %vm198_vm2, %v2177_v27 }
0x1682   :  { %v2219_v30 = vpop.f32.mrb[76].mxu0 }
0x1683   :  { %v2220_v32 = vadd.f32 %v2219_v30, %v3062_v24  ;;  %v2866_v33 = vpop.f32.mrb[77].mxu0 }
0x1684   :  { %v2222_v34 = vpop.f32.mrb[78].mxu0 }
0x1685   :  { %v2867_v35 = vpop.f32.mrb[79].mxu0  ;;  %v2225_v37 = vsel %vm245_vm4, %v2220_v32, -inf }
0x1686   :  { %2226 = vmax.xlane.f32.xlu0 %v2225_v37 }
0x169c   :  { %587 = vrot.lane.b32.xlu0 %v3146_v36, %s2988_s1  ;;  %v2173_v36 = vpop.f32.mrb[74].mxu1 }
0x169d   :  { %v2861_v43 = vpop.f32.mrb[75].mxu1 }
0x16a0   :  { %2004 = vrot.lane.b32.xlu0 %v1997_v14, %s2989_s23 }
0x1713   :  { %v2227_v38 = vpop.xlane.xlu0 %2226 }
0x1714   :  { %v2228_v39 = vsub.f32 %v2220_v32, %v2227_v38 }
0x1716   :  { %v2229_v52 = vmul.f32 1.442695, %v2228_v39 }
0x1717   :  { %v588_v40 = vpop.permute.xlu0 %587 }
0x1718   :  { %2958 = vpow2.f32 %v2229_v52  ;;  %591 = vst.msk [vmem:[#allocation2] sm:$0xff] %vm590_vm6, %v588_v40 }
0x171b   :  { %v2005_v49 = vpop.permute.xlu0 %2004 }
0x1722   :  { %v2959_v1 = vpop.eup %2958 }
0x1723   :  { %v2231_v24 = vsel %vm245_vm4, %v2959_v1, 0.0 }
0x1724   :  { %2232 = vadd.xlane.f32.xlu1 %v2231_v24 }
0x1735   :  { %872 = vrot.lane.b32.xlu1 %v3197_v17, %s2989_s23 }
0x1739   :  { %1157 = vrot.lane.b32.xlu1 %v3253_v63, %s2990_s24 }
0x173d   :  { %1723 = vrot.lane.b32.xlu1 %v3354_v31, %s2988_s1 }
0x17b1   :  { %v2233_v45 = vpop.xlane.xlu1 %2232 }
0x17b2   :  { %2960 = vrcp.f32 %v2233_v45 }
0x17b5   :  { %v873_v46 = vpop.permute.xlu1 %872 }
0x17b6   :  { %876 = vst.msk [vmem:[#allocation2] sm:$0xff] %vm875_vm7, %v873_v46 }
0x17b9   :  { %v1158_v17 = vpop.permute.xlu1 %1157 }
0x17ba   :  { %1161 = vst.msk [vmem:[#allocation2] sm:$0xff] %vm1160_vm8, %v1158_v17 }
0x17bc   :  { %v2961_v47 = vpop.eup %2960 }
0x17bd   :  { %v2235_v48 = vmul.f32 %v2961_v47, %v2959_v1  ;;  %v1724_v63 = vpop.permute.xlu1 %1723 }
0x17be   :  { %1726 = vst.msk [vmem:[#allocation2 + $0x8] sm:$0xff] %vm590_vm6, %v1724_v63 }
0x17bf   :  { %2007 = vst.msk [vmem:[#allocation2 + $0x8] sm:$0xff] %vm875_vm7, %v2005_v49  ;;  %v2236_v31 = vpack.c.bf16 %v2235_v48, %v2235_v48 }
0x17c1   :  { %2871 = vmatmul.mubr.msk.bf16.vlgmr.msra.gmra.mrb[76].mxu1 %vm245_vm4, %v2236_v31 }
0x1894   :  { %v2278_v50 = vpop.f32.mrb[76].mxu1 }
0x1895   :  { %2285 = vrot.lane.b32.xlu1 %v2278_v50, %s2990_s24  ;;  %v2872_v51 = vpop.f32.mrb[77].mxu1 }
0x1896   :  { %v2281_v53 = vpop.f32.mrb[78].mxu1 }
0x1897   :  { %v2873_v54 = vpop.f32.mrb[79].mxu1 }
0x1907   :  { %v2286_v55 = vpop.permute.xlu1 %2285 }
0x1908   :  { %2288 = vst.msk [vmem:[#allocation2 + $0x8] sm:$0xff] %vm1160_vm8, %v2286_v55 }
0x1909   :  { %2973 = shalt.err (!%p2970_p4)
}
0x190a   :  { %s2974_s30 = scalar_lea.hbm %s3446_s2, 256 }
0x190b   :  { %p2975_p5 = scmp.ne.s32.totalorder %s3446_s2, %s2974_s30  ;;  %p2978_p6 = scmp.lt.u32.totalorder %s2974_s30, %s3446_s2 }
0x190d   :  { %p2980_p7 = pnand %p2978_p6, %p2975_p5 }
0x190f   :  { %2983 = shalt.err (!%p2980_p7)
}
0x1910   :  { %s2992_s7 = smov 128   ;;  %s2993_s8 = smov 8  }
0x1911   :  { %2300 = dma.vmem_to_hbm [thread:$0]  %s2295_s26, 256, %s3446_s2, [#allocation3], %s2992_s7, %s2992_s7, %s2993_s8  }
0x1912   :  { %2984 = dma.done.wait [#allocation3], 256  }
0x1913   :  { %2985 = vsyncadd [#allocation3], 4294967040 }
0x1914   :  { %2304 = vsyncpa [#allocation3], 1 }

</bundles_post_ra>
